<compile_context>
chip_gen: v7x
topology: tpu7x:2x2x1
jax: 0.10.0
libtpu: 0.0.40
codegen_flags: <defaults>
</compile_context>

<pallas_src>
import functools

import jax
import jax.numpy as jnp
from jax.experimental import pallas as pl
from jax.experimental.pallas import tpu as pltpu

_VMEM_LIMIT = 64 * 1024 * 1024


# ----------------------------------------------------------------------------
# Tile selection helpers
# ----------------------------------------------------------------------------

def _pick_row_tile(m, candidates=(512, 256, 128, 64, 32, 16, 8)):
    """Largest sublane-aligned tile that divides m; else one full block."""
    for c in candidates:
        if m % c == 0:
            return c
    # TODO(synk): at real vit_small sizes (B*N = B*785, not a multiple of 8)
    # pad the token axis to a multiple of 8 instead of one monolithic block.
    return m


def _pick_lane_tile(n, candidates=(512, 384, 256, 128)):
    """Largest lane-aligned tile that divides n; else one full block."""
    for c in candidates:
        if n % c == 0:
            return c
    return n


def _gelu(y):
    # TODO(synk): PyTorch nn.GELU default is exact erf; tanh approximation is
    # used here (maps onto the TPU EUP, ~1e-3 relative deviation).
    return 0.5 * y * (1.0 + jnp.tanh(0.7978845608028654 * (y + 0.044715 * y * y * y)))


def _layernorm_math(x, g, b, eps):
    mu = jnp.mean(x, axis=-1, keepdims=True)
    xc = x - mu
    var = jnp.mean(xc * xc, axis=-1, keepdims=True)
    return xc * jax.lax.rsqrt(var + eps) * g + b


# ----------------------------------------------------------------------------
# Pallas kernels
# ----------------------------------------------------------------------------

def _dense_kernel(x_ref, w_ref, b_ref, *rest, activation):
    """o = act(x @ w + b) [+ residual].  bf16 MXU inputs, f32 epilogue."""
    if len(rest) == 2:
        r_ref, o_ref = rest
    else:
        r_ref, o_ref = None, rest[0]
    y = jnp.dot(x_ref[...], w_ref[...], preferred_element_type=jnp.float32)
    y = y + b_ref[...]
    if activation == "gelu":
        y = _gelu(y)
    if r_ref is not None:
        y = y + r_ref[...]
    o_ref[...] = y.astype(o_ref.dtype)


def dense(x, w, b, *, activation=None, residual=None, out_dtype=jnp.float32):
    """Tiled y = act(x @ w + b) [+ residual]; grid over (M, N), K kept whole."""
    M, K = x.shape
    N = w.shape[1]
    tm = _pick_row_tile(M)
    tn = _pick_lane_tile(N)
    grid = (M // tm, N // tn)
    in_specs = [
        pl.BlockSpec((tm, K), lambda i, j: (i, 0)),
        pl.BlockSpec((K, tn), lambda i, j: (0, j)),
        pl.BlockSpec((1, tn), lambda i, j: (0, j)),
    ]
    args = [x.astype(jnp.bfloat16), w.astype(jnp.bfloat16), b.reshape(1, N)]
    if residual is not None:
        in_specs.append(pl.BlockSpec((tm, tn), lambda i, j: (i, j)))
        args.append(residual)
    return pl.pallas_call(
        functools.partial(_dense_kernel, activation=activation),
        grid=grid,
        in_specs=in_specs,
        out_specs=pl.BlockSpec((tm, tn), lambda i, j: (i, j)),
        out_shape=jax.ShapeDtypeStruct((M, N), out_dtype),
        compiler_params=pltpu.CompilerParams(
            dimension_semantics=("parallel", "parallel"),
            vmem_limit_bytes=_VMEM_LIMIT,
        ),
    )(*args)


def _ln_dense_kernel(x_ref, g_ref, bln_ref, w_ref, b_ref, o_ref, *, eps):
    """o = LayerNorm(x) @ w + b  (LN in f32, matmul inputs bf16)."""
    h = _layernorm_math(x_ref[...], g_ref[...], bln_ref[...], eps)
    y = jnp.dot(h.astype(jnp.bfloat16), w_ref[...], preferred_element_type=jnp.float32)
    o_ref[...] = (y + b_ref[...]).astype(o_ref.dtype)


def ln_dense(x, g, bln, w, b, *, eps=1e-6, out_dtype=jnp.float32):
    M, K = x.shape
    N = w.shape[1]
    tm = _pick_row_tile(M)
    tn = _pick_lane_tile(N)
    grid = (M // tm, N // tn)
    return pl.pallas_call(
        functools.partial(_ln_dense_kernel, eps=eps),
        grid=grid,
        in_specs=[
            pl.BlockSpec((tm, K), lambda i, j: (i, 0)),
            pl.BlockSpec((1, K), lambda i, j: (0, 0)),
            pl.BlockSpec((1, K), lambda i, j: (0, 0)),
            pl.BlockSpec((K, tn), lambda i, j: (0, j)),
            pl.BlockSpec((1, tn), lambda i, j: (0, j)),
        ],
        out_specs=pl.BlockSpec((tm, tn), lambda i, j: (i, j)),
        out_shape=jax.ShapeDtypeStruct((M, N), out_dtype),
        compiler_params=pltpu.CompilerParams(
            dimension_semantics=("parallel", "parallel"),
            vmem_limit_bytes=_VMEM_LIMIT,
        ),
    )(x, g.reshape(1, K), bln.reshape(1, K), w.astype(jnp.bfloat16), b.reshape(1, N))


def _ln_mlp_kernel(x_ref, g_ref, bln_ref, w1_ref, b1_ref, w2_ref, b2_ref, o_ref, *, eps):
    """o = x + fc2(GELU(fc1(LayerNorm(x)))); hidden activation stays in VMEM."""
    xt = x_ref[...]
    h = _layernorm_math(xt, g_ref[...], bln_ref[...], eps)
    u = jnp.dot(h.astype(jnp.bfloat16), w1_ref[...], preferred_element_type=jnp.float32)
    u = _gelu(u + b1_ref[...])
    y = jnp.dot(u.astype(jnp.bfloat16), w2_ref[...], preferred_element_type=jnp.float32)
    o_ref[...] = (xt + y + b2_ref[...]).astype(o_ref.dtype)


def ln_mlp(x, g, bln, w1, b1, w2, b2, *, eps=1e-6):
    M, D = x.shape
    Hd = w1.shape[1]
    tm = _pick_row_tile(M)
    return pl.pallas_call(
        functools.partial(_ln_mlp_kernel, eps=eps),
        grid=(M // tm,),
        in_specs=[
            pl.BlockSpec((tm, D), lambda i: (i, 0)),
            pl.BlockSpec((1, D), lambda i: (0, 0)),
            pl.BlockSpec((1, D), lambda i: (0, 0)),
            pl.BlockSpec((D, Hd), lambda i: (0, 0)),
            pl.BlockSpec((1, Hd), lambda i: (0, 0)),
            pl.BlockSpec((Hd, D), lambda i: (0, 0)),
            pl.BlockSpec((1, D), lambda i: (0, 0)),
        ],
        out_specs=pl.BlockSpec((tm, D), lambda i: (i, 0)),
        out_shape=jax.ShapeDtypeStruct((M, D), jnp.float32),
        compiler_params=pltpu.CompilerParams(
            dimension_semantics=("parallel",),
            vmem_limit_bytes=_VMEM_LIMIT,
        ),
    )(x, g.reshape(1, D), bln.reshape(1, D),
      w1.astype(jnp.bfloat16), b1.reshape(1, Hd),
      w2.astype(jnp.bfloat16), b2.reshape(1, D))


def _layernorm_kernel(x_ref, g_ref, b_ref, o_ref, *, eps):
    o_ref[...] = _layernorm_math(x_ref[...], g_ref[...], b_ref[...], eps).astype(o_ref.dtype)


def layernorm(x, g, b, eps=1e-6):
    M, D = x.shape
    tm = _pick_row_tile(M)
    return pl.pallas_call(
        functools.partial(_layernorm_kernel, eps=eps),
        grid=(M // tm,),
        in_specs=[
            pl.BlockSpec((tm, D), lambda i: (i, 0)),
            pl.BlockSpec((1, D), lambda i: (0, 0)),
            pl.BlockSpec((1, D), lambda i: (0, 0)),
        ],
        out_specs=pl.BlockSpec((tm, D), lambda i: (i, 0)),
        out_shape=jax.ShapeDtypeStruct((M, D), jnp.float32),
        compiler_params=pltpu.CompilerParams(
            dimension_semantics=("parallel",),
            vmem_limit_bytes=_VMEM_LIMIT,
        ),
    )(x, g.reshape(1, D), b.reshape(1, D))


def _attention_kernel(qkv_ref, o_ref, *, num_heads, head_dim, scale):
    """All heads of one batch element; qkv packed as (q|k|v) x heads on lanes.

    Writes ctx in [N, H*Dh] layout (no transpose needed downstream) and never
    materializes the [N, N] attention matrix in HBM.
    """
    D = num_heads * head_dim
    qkv = qkv_ref[...]                                     # [N, 3D] f32
    parts = []
    for h in range(num_heads):                             # all heads per grid step
        q = qkv[:, h * head_dim:(h + 1) * head_dim].astype(jnp.bfloat16)
        k = qkv[:, D + h * head_dim:D + (h + 1) * head_dim].astype(jnp.bfloat16)
        v = qkv[:, 2 * D + h * head_dim:2 * D + (h + 1) * head_dim].astype(jnp.bfloat16)
        # q @ k^T without materializing a transpose.
        s = jax.lax.dot_general(
            q, k, (((1,), (1,)), ((), ())), preferred_element_type=jnp.float32
        ) * scale
        m = jnp.max(s, axis=-1, keepdims=True)
        e = jnp.exp(s - m)
        p = e * pl.reciprocal(jnp.sum(e, axis=-1, keepdims=True), approx=True)
        parts.append(jnp.dot(p.astype(jnp.bfloat16), v,
                             preferred_element_type=jnp.float32))
    o_ref[...] = jnp.concatenate(parts, axis=-1).astype(o_ref.dtype)


def attention(qkv, num_heads):
    """qkv: [B, N, 3D] (layout (3, heads, Dh) on the last axis) -> ctx [B, N, D]."""
    B, N, threeD = qkv.shape
    D = threeD // 3
    head_dim = D // num_heads
    scale = float(head_dim) ** -0.5
    return pl.pallas_call(
        functools.partial(_attention_kernel, num_heads=num_heads,
                          head_dim=head_dim, scale=scale),
        grid=(B,),
        in_specs=[pl.BlockSpec((None, N, threeD), lambda b: (b, 0, 0))],
        out_specs=pl.BlockSpec((None, N, D), lambda b: (b, 0, 0)),
        out_shape=jax.ShapeDtypeStruct((B, N, D), jnp.bfloat16),
        compiler_params=pltpu.CompilerParams(
            dimension_semantics=("parallel",),
            vmem_limit_bytes=_VMEM_LIMIT,
        ),
    )(qkv)


# ----------------------------------------------------------------------------
# ViT forward (glue in JAX, compute in Pallas kernels)
# ----------------------------------------------------------------------------

def transformer_block(xf, B, N, p, num_heads):
    """Pre-LN transformer block on flattened tokens xf [B*N, D].

    Returns (xf_out [B*N, D] f32, qkv_flat [B*N, 3D] f32).
    """
    D = xf.shape[-1]
    # LN1 fused into the qkv projection.
    qkv_flat = ln_dense(xf, p["ln1_g"], p["ln1_b"], p["qkv_w"], p["qkv_b"])
    # Attention reads the packed qkv directly; ctx comes back in [B, N, D].
    ctx = attention(qkv_flat.reshape(B, N, 3 * D), num_heads)
    # Output projection with the residual add fused into the epilogue.
    xf = dense(ctx.reshape(B * N, D), p["proj_w"], p["proj_b"], residual=xf)
    # LN2 + fc1 + GELU + fc2 + residual in one kernel (hidden stays in VMEM).
    xf = ln_mlp(xf, p["ln2_g"], p["ln2_b"], p["fc1_w"], p["fc1_b"],
                p["fc2_w"], p["fc2_b"])
    return xf, qkv_flat


def dino_featurizer_forward(img, params, num_heads, patch_size=8,
                            feat_type="feat", n=1, return_class_feat=False):
    """Mirrors DinoFeaturizer.forward.  img: NCHW float32."""
    B, C, H, W = img.shape
    assert H % patch_size == 0
    assert W % patch_size == 0
    feat_h = H // patch_size
    feat_w = W // patch_size

    # Patch embedding (conv with kernel=stride=patch_size == per-patch matmul).
    patches = img.reshape(B, C, feat_h, patch_size, feat_w, patch_size)
    patches = patches.transpose(0, 2, 4, 1, 3, 5)                    # [B,fh,fw,C,P,P]
    patches = patches.reshape(B * feat_h * feat_w, C * patch_size * patch_size)
    x = dense(patches, params["patch_w"], params["patch_b"])         # [B*fh*fw, D]
    D = x.shape[-1]
    x = x.reshape(B, feat_h * feat_w, D)

    # cls token + positional embedding.
    cls = jnp.broadcast_to(params["cls_token"], (B, 1, D))
    x = jnp.concatenate([cls, x], axis=1)                            # [B, N, D]
    x = x + params["pos_embed"]
    N = x.shape[1]
    xf = x.reshape(B * N, D)

    feat = qkv_last = None
    num_blocks = len(params["blocks"])
    keep_idx = max(num_blocks - n, 0)   # get_intermediate_feat(...)[0]
    for i, blk in enumerate(params["blocks"]):
        xf, qkv_flat = transformer_block(xf, B, N, blk, num_heads)
        if i == keep_idx:
            feat = layernorm(xf, params["norm_g"], params["norm_b"]).reshape(B, N, D)
            qkv_last = qkv_flat
    # NOTE: get_intermediate_feat also returns attention maps, but
    # DinoFeaturizer.forward never consumes them, so they are not materialized.
    # TODO(synk): add an optional [B, H, N, N] attention output if ever needed.

    if return_class_feat:
        return feat[:, :1, :].reshape(B, 1, 1, D).transpose(0, 3, 1, 2)

    if feat_type == "feat":
        image_feat = feat[:, 1:, :].reshape(B, feat_h, feat_w, D).transpose(0, 3, 1, 2)
    elif feat_type == "KK":
        # Reference hard-codes 6 heads (vit_small); we use the synthetic count.
        Dh = D // num_heads
        k_all = qkv_last.reshape(B, N, 3, num_heads, Dh)[:, :, 1]     # [B, N, H, Dh]
        image_k = k_all[:, 1:].transpose(0, 2, 1, 3).reshape(
            B, num_heads, feat_h, feat_w, Dh)
        Bk, Hh, I, J, Dd = image_k.shape
        image_feat = image_k.transpose(0, 1, 4, 2, 3).reshape(Bk, Hh * Dd, I, J)
    else:
        raise ValueError("Unknown feat type:{}".format(feat_type))
    return image_feat


# ----------------------------------------------------------------------------
# Deterministic parameter init (synthetic stand-in for the DINO checkpoint)
# ----------------------------------------------------------------------------

def init_params(key, embed_dim, depth, in_chans, patch_size, n_tokens, mlp_ratio=4):
    # TODO(synk): real module loads pretrained DINO vit_small weights via torch.hub.
    D = embed_dim
    hidden = mlp_ratio * D
    patch_dim = in_chans * patch_size * patch_size
    keys = jax.random.split(key, 4 + depth)
    std = 0.02
    bf16 = jnp.bfloat16

    def nrm(k, shape, dtype=jnp.float32):
        return (std * jax.random.normal(k, shape, jnp.float32)).astype(dtype)

    params = {
        "patch_w": nrm(keys[0], (patch_dim, D), bf16),
        "patch_b": jnp.zeros((D,), jnp.float32),
        "cls_token": nrm(keys[1], (1, 1, D)),
        "pos_embed": nrm(keys[2], (1, n_tokens, D)),
        "norm_g": jnp.ones((D,), jnp.float32),
        "norm_b": jnp.zeros((D,), jnp.float32),
        "blocks": [],
    }
    for i in range(depth):
        bk = jax.random.split(keys[4 + i], 4)
        params["blocks"].append({
            "ln1_g": jnp.ones((D,), jnp.float32),
            "ln1_b": jnp.zeros((D,), jnp.float32),
            "qkv_w": nrm(bk[0], (D, 3 * D), bf16),     # last axis packed (3, heads, Dh)
            "qkv_b": jnp.zeros((3 * D,), jnp.float32),
            "proj_w": nrm(bk[1], (D, D), bf16),
            "proj_b": jnp.zeros((D,), jnp.float32),
            "ln2_g": jnp.ones((D,), jnp.float32),
            "ln2_b": jnp.zeros((D,), jnp.float32),
            "fc1_w": nrm(bk[2], (D, hidden), bf16),
            "fc1_b": jnp.zeros((hidden,), jnp.float32),
            "fc2_w": nrm(bk[3], (hidden, D), bf16),
            "fc2_b": jnp.zeros((D,), jnp.float32),
        })
    return params


# ----------------------------------------------------------------------------
# Main
# ----------------------------------------------------------------------------

if __name__ == "__main__":
    B, C, H, W = 2, 3, 16, 16
    patch_size = 8
    embed_dim = 32
    depth = 2
    num_heads = 4

    key = jax.random.PRNGKey(0)
    k_img, k_par = jax.random.split(key)
    img = jax.random.normal(k_img, (B, C, H, W), jnp.float32)

    n_tokens = (H // patch_size) * (W // patch_size) + 1
    params = init_params(k_par, embed_dim, depth, C, patch_size, n_tokens)

    fwd = jax.jit(lambda im, pr: dino_featurizer_forward(
        im, pr, num_heads=num_heads, patch_size=patch_size, feat_type="feat", n=1))
    image_feat = jax.block_until_ready(fwd(img, params))
    assert image_feat.shape == (B, embed_dim, H // patch_size, W // patch_size)
    assert image_feat.dtype == jnp.float32

    # Also exercise the class-feature branch.
    class_feat = dino_featurizer_forward(img, params, num_heads=num_heads,
                                         patch_size=patch_size, feat_type="feat",
                                         n=1, return_class_feat=True)
    class_feat = jax.block_until_ready(class_feat)
    assert class_feat.shape == (B, embed_dim, 1, 1)

    print("KERNEL_OK")
</pallas_src>

<mosaic_0001>
module attributes {stable_mosaic.version = 11 : i64} {
  func.func @_dense_kernel(%arg0: i32, %arg1: i32, %arg2: memref<8x192xbf16, #tpu.memory_space<vmem>>, %arg3: memref<192x32xbf16, #tpu.memory_space<vmem>>, %arg4: memref<1x32xf32, #tpu.memory_space<vmem>>, %arg5: memref<8x32xf32, #tpu.memory_space<vmem>>) attributes {dimension_semantics = [#tpu.dimension_semantics<parallel>, #tpu.dimension_semantics<parallel>], iteration_bounds = array<i64: 1, 1>, scalar_prefetch = 0 : i64, scratch_operands = 0 : i64, tpu.core_type = #tpu.core_type<tc>, window_params = [{transform_indices = @transform_0, window_bounds = array<i64: 8, 192>}, {transform_indices = @transform_1, window_bounds = array<i64: 192, 32>}, {transform_indices = @transform_2, window_bounds = array<i64: 1, 32>}, {transform_indices = @transform_3, window_bounds = array<i64: 8, 32>}]} {
    %c0 = arith.constant 0 : index
    %c0_0 = arith.constant 0 : index
    %0 = vector.load %arg2[%c0, %c0_0] : memref<8x192xbf16, #tpu.memory_space<vmem>>, vector<8x192xbf16>
    %c0_1 = arith.constant 0 : index
    %c0_2 = arith.constant 0 : index
    %1 = vector.load %arg3[%c0_1, %c0_2] : memref<192x32xbf16, #tpu.memory_space<vmem>>, vector<192x32xbf16>
    %cst = arith.constant dense<0.000000e+00> : vector<8x32xf32>
    %2 = tpu.matmul %0, %1, %cst {dimension_numbers = #tpu.dot_dimension_numbers<[1], [0], [0], [1], [0, 0, 1, 1], [], []>} : vector<8x192xbf16>, vector<192x32xbf16>, vector<8x32xf32> -> vector<8x32xf32>
    %c0_3 = arith.constant 0 : index
    %c0_4 = arith.constant 0 : index
    %3 = vector.load %arg4[%c0_3, %c0_4] : memref<1x32xf32, #tpu.memory_space<vmem>>, vector<1x32xf32>
    %4 = vector.broadcast %3 : vector<1x32xf32> to vector<8x32xf32>
    %5 = arith.addf %2, %4 : vector<8x32xf32>
    %c0_5 = arith.constant 0 : index
    %c0_6 = arith.constant 0 : index
    %6 = vector.load %arg5[%c0_5, %c0_6] : memref<8x32xf32, #tpu.memory_space<vmem>>, vector<8x32xf32>
    tpu.vector_store %arg5[%c0_5, %c0_6], %5 {strides = array<i32>} : memref<8x32xf32, #tpu.memory_space<vmem>>, vector<8x32xf32>,
    return
  }
  func.func @transform_0(%arg0: i32, %arg1: i32) -> (i32, i32) {
    %c0_i32 = arith.constant 0 : i32
    %c0_i32_0 = arith.constant 0 : i32
    return %arg0, %c0_i32 : i32, i32
  }
  func.func @transform_1(%arg0: i32, %arg1: i32) -> (i32, i32) {
    %c0_i32 = arith.constant 0 : i32
    %c0_i32_0 = arith.constant 0 : i32
    return %c0_i32, %arg1 : i32, i32
  }
  func.func @transform_2(%arg0: i32, %arg1: i32) -> (i32, i32) {
    %c0_i32 = arith.constant 0 : i32
    %c0_i32_0 = arith.constant 0 : i32
    return %c0_i32, %arg1 : i32, i32
  }
  func.func @transform_3(%arg0: i32, %arg1: i32) -> (i32, i32) {
    %c0_i32 = arith.constant 0 : i32
    return %arg0, %arg1 : i32, i32
  }
}

module attributes {stable_mosaic.version = 11 : i64} {
  func.func @_ln_dense_kernel(%arg0: i32, %arg1: i32, %arg2: memref<10x32xf32, #tpu.memory_space<vmem>>, %arg3: memref<1x32xf32, #tpu.memory_space<vmem>>, %arg4: memref<1x32xf32, #tpu.memory_space<vmem>>, %arg5: memref<32x96xbf16, #tpu.memory_space<vmem>>, %arg6: memref<1x96xf32, #tpu.memory_space<vmem>>, %arg7: memref<10x96xf32, #tpu.memory_space<vmem>>) attributes {dimension_semantics = [#tpu.dimension_semantics<parallel>, #tpu.dimension_semantics<parallel>], iteration_bounds = array<i64: 1, 1>, scalar_prefetch = 0 : i64, scratch_operands = 0 : i64, tpu.core_type = #tpu.core_type<tc>, window_params = [{transform_indices = @transform_0, window_bounds = array<i64: 10, 32>}, {pipeline_mode = #tpu.pipeline_mode<synchronous>, transform_indices = @transform_1, window_bounds = array<i64: 1, 32>}, {pipeline_mode = #tpu.pipeline_mode<synchronous>, transform_indices = @transform_2, window_bounds = array<i64: 1, 32>}, {transform_indices = @transform_3, window_bounds = array<i64: 32, 96>}, {transform_indices = @transform_4, window_bounds = array<i64: 1, 96>}, {transform_indices = @transform_5, window_bounds = array<i64: 10, 96>}]} {
    %c0 = arith.constant 0 : index
    %c0_0 = arith.constant 0 : index
    %0 = vector.load %arg2[%c0, %c0_0] : memref<10x32xf32, #tpu.memory_space<vmem>>, vector<10x32xf32>
    %c0_1 = arith.constant 0 : index
    %c0_2 = arith.constant 0 : index
    %1 = vector.load %arg3[%c0_1, %c0_2] : memref<1x32xf32, #tpu.memory_space<vmem>>, vector<1x32xf32>
    %c0_3 = arith.constant 0 : index
    %c0_4 = arith.constant 0 : index
    %2 = vector.load %arg4[%c0_3, %c0_4] : memref<1x32xf32, #tpu.memory_space<vmem>>, vector<1x32xf32>
    %cst = arith.constant dense<0.000000e+00> : vector<10xf32>
    %3 = vector.multi_reduction <add>, %0, %cst [1] : vector<10x32xf32> to vector<10xf32>
    %4 = vector.shape_cast %3 : vector<10xf32> to vector<10x1xf32>
    %cst_5 = arith.constant 3.200000e+01 : f32
    %5 = vector.broadcast %cst_5 : f32 to vector<10x1xf32>
    %6 = arith.divf %4, %5 : vector<10x1xf32>
    %7 = vector.broadcast %6 : vector<10x1xf32> to vector<10x32xf32>
    %8 = arith.subf %0, %7 : vector<10x32xf32>
    %9 = arith.mulf %8, %8 : vector<10x32xf32>
    %cst_6 = arith.constant dense<0.000000e+00> : vector<10xf32>
    %10 = vector.multi_reduction <add>, %9, %cst_6 [1] : vector<10x32xf32> to vector<10xf32>
    %11 = vector.shape_cast %10 : vector<10xf32> to vector<10x1xf32>
    %cst_7 = arith.constant 3.200000e+01 : f32
    %12 = vector.broadcast %cst_7 : f32 to vector<10x1xf32>
    %13 = arith.divf %11, %12 : vector<10x1xf32>
    %cst_8 = arith.constant 9.99999997E-7 : f32
    %14 = vector.broadcast %cst_8 : f32 to vector<10x1xf32>
    %15 = arith.addf %13, %14 : vector<10x1xf32>
    %16 = math.rsqrt %15 : vector<10x1xf32>
    %17 = vector.broadcast %16 : vector<10x1xf32> to vector<10x32xf32>
    %18 = arith.mulf %8, %17 : vector<10x32xf32>
    %19 = vector.broadcast %1 : vector<1x32xf32> to vector<10x32xf32>
    %20 = arith.mulf %18, %19 : vector<10x32xf32>
    %21 = vector.broadcast %2 : vector<1x32xf32> to vector<10x32xf32>
    %22 = arith.addf %20, %21 : vector<10x32xf32>
    %23 = arith.truncf %22 : vector<10x32xf32> to vector<10x32xbf16>
    %c0_9 = arith.constant 0 : index
    %c0_10 = arith.constant 0 : index
    %24 = vector.load %arg5[%c0_9, %c0_10] : memref<32x96xbf16, #tpu.memory_space<vmem>>, vector<32x96xbf16>
    %cst_11 = arith.constant dense<0.000000e+00> : vector<10x96xf32>
    %25 = tpu.matmul %23, %24, %cst_11 {dimension_numbers = #tpu.dot_dimension_numbers<[1], [0], [0], [1], [0, 0, 1, 1], [], []>} : vector<10x32xbf16>, vector<32x96xbf16>, vector<10x96xf32> -> vector<10x96xf32>
    %c0_12 = arith.constant 0 : index
    %c0_13 = arith.constant 0 : index
    %26 = vector.load %arg6[%c0_12, %c0_13] : memref<1x96xf32, #tpu.memory_space<vmem>>, vector<1x96xf32>
    %27 = vector.broadcast %26 : vector<1x96xf32> to vector<10x96xf32>
    %28 = arith.addf %25, %27 : vector<10x96xf32>
    %c0_14 = arith.constant 0 : index
    %c0_15 = arith.constant 0 : index
    %29 = vector.load %arg7[%c0_14, %c0_15] : memref<10x96xf32, #tpu.memory_space<vmem>>, vector<10x96xf32>
    tpu.vector_store %arg7[%c0_14, %c0_15], %28 {strides = array<i32>} : memref<10x96xf32, #tpu.memory_space<vmem>>, vector<10x96xf32>,
    return
  }
  func.func @transform_0(%arg0: i32, %arg1: i32) -> (i32, i32) {
    %c0_i32 = arith.constant 0 : i32
    %c0_i32_0 = arith.constant 0 : i32
    return %arg0, %c0_i32 : i32, i32
  }
  func.func @transform_1(%arg0: i32, %arg1: i32) -> (i32, i32) {
    %c0_i32 = arith.constant 0 : i32
    %c0_i32_0 = arith.constant 0 : i32
    %c0_i32_1 = arith.constant 0 : i32
    return %c0_i32, %c0_i32_0 : i32, i32
  }
  func.func @transform_2(%arg0: i32, %arg1: i32) -> (i32, i32) {
    %c0_i32 = arith.constant 0 : i32
    %c0_i32_0 = arith.constant 0 : i32
    %c0_i32_1 = arith.constant 0 : i32
    return %c0_i32, %c0_i32_0 : i32, i32
  }
  func.func @transform_3(%arg0: i32, %arg1: i32) -> (i32, i32) {
    %c0_i32 = arith.constant 0 : i32
    %c0_i32_0 = arith.constant 0 : i32
    return %c0_i32, %arg1 : i32, i32
  }
  func.func @transform_4(%arg0: i32, %arg1: i32) -> (i32, i32) {
    %c0_i32 = arith.constant 0 : i32
    %c0_i32_0 = arith.constant 0 : i32
    return %c0_i32, %arg1 : i32, i32
  }
  func.func @transform_5(%arg0: i32, %arg1: i32) -> (i32, i32) {
    %c0_i32 = arith.constant 0 : i32
    return %arg0, %arg1 : i32, i32
  }
}

module attributes {stable_mosaic.version = 11 : i64} {
  func.func @_dense_kernel(%arg0: i32, %arg1: i32, %arg2: memref<10x32xbf16, #tpu.memory_space<vmem>>, %arg3: memref<32x32xbf16, #tpu.memory_space<vmem>>, %arg4: memref<1x32xf32, #tpu.memory_space<vmem>>, %arg5: memref<10x32xf32, #tpu.memory_space<vmem>>, %arg6: memref<10x32xf32, #tpu.memory_space<vmem>>) attributes {dimension_semantics = [#tpu.dimension_semantics<parallel>, #tpu.dimension_semantics<parallel>], iteration_bounds = array<i64: 1, 1>, scalar_prefetch = 0 : i64, scratch_operands = 0 : i64, tpu.core_type = #tpu.core_type<tc>, window_params = [{transform_indices = @transform_0, window_bounds = array<i64: 10, 32>}, {transform_indices = @transform_1, window_bounds = array<i64: 32, 32>}, {transform_indices = @transform_2, window_bounds = array<i64: 1, 32>}, {transform_indices = @transform_3, window_bounds = array<i64: 10, 32>}, {transform_indices = @transform_4, window_bounds = array<i64: 10, 32>}]} {
    %c0 = arith.constant 0 : index
    %c0_0 = arith.constant 0 : index
    %0 = vector.load %arg2[%c0, %c0_0] : memref<10x32xbf16, #tpu.memory_space<vmem>>, vector<10x32xbf16>
    %c0_1 = arith.constant 0 : index
    %c0_2 = arith.constant 0 : index
    %1 = vector.load %arg3[%c0_1, %c0_2] : memref<32x32xbf16, #tpu.memory_space<vmem>>, vector<32x32xbf16>
    %cst = arith.constant dense<0.000000e+00> : vector<10x32xf32>
    %2 = tpu.matmul %0, %1, %cst {dimension_numbers = #tpu.dot_dimension_numbers<[1], [0], [0], [1], [0, 0, 1, 1], [], []>} : vector<10x32xbf16>, vector<32x32xbf16>, vector<10x32xf32> -> vector<10x32xf32>
    %c0_3 = arith.constant 0 : index
    %c0_4 = arith.constant 0 : index
    %3 = vector.load %arg4[%c0_3, %c0_4] : memref<1x32xf32, #tpu.memory_space<vmem>>, vector<1x32xf32>
    %4 = vector.broadcast %3 : vector<1x32xf32> to vector<10x32xf32>
    %5 = arith.addf %2, %4 : vector<10x32xf32>
    %c0_5 = arith.constant 0 : index
    %c0_6 = arith.constant 0 : index
    %6 = vector.load %arg5[%c0_5, %c0_6] : memref<10x32xf32, #tpu.memory_space<vmem>>, vector<10x32xf32>
    %7 = arith.addf %5, %6 : vector<10x32xf32>
    %c0_7 = arith.constant 0 : index
    %c0_8 = arith.constant 0 : index
    %8 = vector.load %arg6[%c0_7, %c0_8] : memref<10x32xf32, #tpu.memory_space<vmem>>, vector<10x32xf32>
    tpu.vector_store %arg6[%c0_7, %c0_8], %7 {strides = array<i32>} : memref<10x32xf32, #tpu.memory_space<vmem>>, vector<10x32xf32>,
    return
  }
  func.func @transform_0(%arg0: i32, %arg1: i32) -> (i32, i32) {
    %c0_i32 = arith.constant 0 : i32
    %c0_i32_0 = arith.constant 0 : i32
    return %arg0, %c0_i32 : i32, i32
  }
  func.func @transform_1(%arg0: i32, %arg1: i32) -> (i32, i32) {
    %c0_i32 = arith.constant 0 : i32
    %c0_i32_0 = arith.constant 0 : i32
    return %c0_i32, %arg1 : i32, i32
  }
  func.func @transform_2(%arg0: i32, %arg1: i32) -> (i32, i32) {
    %c0_i32 = arith.constant 0 : i32
    %c0_i32_0 = arith.constant 0 : i32
    return %c0_i32, %arg1 : i32, i32
  }
  func.func @transform_3(%arg0: i32, %arg1: i32) -> (i32, i32) {
    %c0_i32 = arith.constant 0 : i32
    return %arg0, %arg1 : i32, i32
  }
  func.func @transform_4(%arg0: i32, %arg1: i32) -> (i32, i32) {
    %c0_i32 = arith.constant 0 : i32
    return %arg0, %arg1 : i32, i32
  }
}

module attributes {stable_mosaic.version = 11 : i64} {
  func.func @_attention_kernel(%arg0: i32, %arg1: memref<1x5x96xf32, #tpu.memory_space<vmem>>, %arg2: memref<1x5x32xbf16, #tpu.memory_space<vmem>>) attributes {dimension_semantics = [#tpu.dimension_semantics<parallel>], iteration_bounds = array<i64: 2>, scalar_prefetch = 0 : i64, scratch_operands = 0 : i64, tpu.core_type = #tpu.core_type<tc>, window_params = [{transform_indices = @transform_0, window_bounds = array<i64: 1, 5, 96>}, {transform_indices = @transform_1, window_bounds = array<i64: 1, 5, 32>}]} {
    %c0 = arith.constant 0 : index
    %c0_0 = arith.constant 0 : index
    %c0_1 = arith.constant 0 : index
    %0 = vector.load %arg1[%c0, %c0_0, %c0_1] : memref<1x5x96xf32, #tpu.memory_space<vmem>>, vector<1x5x96xf32>
    %1 = vector.shape_cast %0 : vector<1x5x96xf32> to vector<5x96xf32>
    %2 = vector.extract_strided_slice %1 {offsets = [0, 0], sizes = [5, 8], strides = [1, 1]} : vector<5x96xf32> to vector<5x8xf32>
    %3 = arith.truncf %2 : vector<5x8xf32> to vector<5x8xbf16>
    %4 = vector.extract_strided_slice %1 {offsets = [0, 32], sizes = [5, 8], strides = [1, 1]} : vector<5x96xf32> to vector<5x8xf32>
    %5 = arith.truncf %4 : vector<5x8xf32> to vector<5x8xbf16>
    %6 = vector.extract_strided_slice %1 {offsets = [0, 64], sizes = [5, 8], strides = [1, 1]} : vector<5x96xf32> to vector<5x8xf32>
    %7 = arith.truncf %6 : vector<5x8xf32> to vector<5x8xbf16>
    %cst = arith.constant dense<0.000000e+00> : vector<5x5xf32>
    %8 = tpu.matmul %3, %5, %cst {dimension_numbers = #tpu.dot_dimension_numbers<[1], [1], [0], [0], [0, 0, 1, 0], [], []>} : vector<5x8xbf16>, vector<5x8xbf16>, vector<5x5xf32> -> vector<5x5xf32>
    %cst_2 = arith.constant 0.353553385 : f32
    %9 = vector.broadcast %cst_2 : f32 to vector<5x5xf32>
    %10 = arith.mulf %8, %9 : vector<5x5xf32>
    %cst_3 = arith.constant dense<0xFF800000> : vector<5xf32>
    %11 = vector.multi_reduction <maximumf>, %10, %cst_3 [1] : vector<5x5xf32> to vector<5xf32>
    %12 = vector.shape_cast %11 : vector<5xf32> to vector<5x1xf32>
    %13 = vector.broadcast %12 : vector<5x1xf32> to vector<5x5xf32>
    %14 = arith.subf %10, %13 : vector<5x5xf32>
    %15 = math.exp %14 : vector<5x5xf32>
    %cst_4 = arith.constant dense<0.000000e+00> : vector<5xf32>
    %16 = vector.multi_reduction <add>, %15, %cst_4 [1] : vector<5x5xf32> to vector<5xf32>
    %17 = vector.shape_cast %16 : vector<5xf32> to vector<5x1xf32>
    %18 = tpu.reciprocal %17 {approx = true} : vector<5x1xf32> -> vector<5x1xf32>
    %19 = vector.broadcast %18 : vector<5x1xf32> to vector<5x5xf32>
    %20 = arith.mulf %15, %19 : vector<5x5xf32>
    %21 = arith.truncf %20 : vector<5x5xf32> to vector<5x5xbf16>
    %cst_5 = arith.constant dense<0.000000e+00> : vector<5x8xf32>
    %22 = tpu.matmul %21, %7, %cst_5 {dimension_numbers = #tpu.dot_dimension_numbers<[1], [0], [0], [1], [0, 0, 1, 1], [], []>} : vector<5x5xbf16>, vector<5x8xbf16>, vector<5x8xf32> -> vector<5x8xf32>
    %23 = vector.extract_strided_slice %1 {offsets = [0, 8], sizes = [5, 8], strides = [1, 1]} : vector<5x96xf32> to vector<5x8xf32>
    %24 = arith.truncf %23 : vector<5x8xf32> to vector<5x8xbf16>
    %25 = vector.extract_strided_slice %1 {offsets = [0, 40], sizes = [5, 8], strides = [1, 1]} : vector<5x96xf32> to vector<5x8xf32>
    %26 = arith.truncf %25 : vector<5x8xf32> to vector<5x8xbf16>
    %27 = vector.extract_strided_slice %1 {offsets = [0, 72], sizes = [5, 8], strides = [1, 1]} : vector<5x96xf32> to vector<5x8xf32>
    %28 = arith.truncf %27 : vector<5x8xf32> to vector<5x8xbf16>
    %cst_6 = arith.constant dense<0.000000e+00> : vector<5x5xf32>
    %29 = tpu.matmul %24, %26, %cst_6 {dimension_numbers = #tpu.dot_dimension_numbers<[1], [1], [0], [0], [0, 0, 1, 0], [], []>} : vector<5x8xbf16>, vector<5x8xbf16>, vector<5x5xf32> -> vector<5x5xf32>
    %cst_7 = arith.constant 0.353553385 : f32
    %30 = vector.broadcast %cst_7 : f32 to vector<5x5xf32>
    %31 = arith.mulf %29, %30 : vector<5x5xf32>
    %cst_8 = arith.constant dense<0xFF800000> : vector<5xf32>
    %32 = vector.multi_reduction <maximumf>, %31, %cst_8 [1] : vector<5x5xf32> to vector<5xf32>
    %33 = vector.shape_cast %32 : vector<5xf32> to vector<5x1xf32>
    %34 = vector.broadcast %33 : vector<5x1xf32> to vector<5x5xf32>
    %35 = arith.subf %31, %34 : vector<5x5xf32>
    %36 = math.exp %35 : vector<5x5xf32>
    %cst_9 = arith.constant dense<0.000000e+00> : vector<5xf32>
    %37 = vector.multi_reduction <add>, %36, %cst_9 [1] : vector<5x5xf32> to vector<5xf32>
    %38 = vector.shape_cast %37 : vector<5xf32> to vector<5x1xf32>
    %39 = tpu.reciprocal %38 {approx = true} : vector<5x1xf32> -> vector<5x1xf32>
    %40 = vector.broadcast %39 : vector<5x1xf32> to vector<5x5xf32>
    %41 = arith.mulf %36, %40 : vector<5x5xf32>
    %42 = arith.truncf %41 : vector<5x5xf32> to vector<5x5xbf16>
    %cst_10 = arith.constant dense<0.000000e+00> : vector<5x8xf32>
    %43 = tpu.matmul %42, %28, %cst_10 {dimension_numbers = #tpu.dot_dimension_numbers<[1], [0], [0], [1], [0, 0, 1, 1], [], []>} : vector<5x5xbf16>, vector<5x8xbf16>, vector<5x8xf32> -> vector<5x8xf32>
    %44 = vector.extract_strided_slice %1 {offsets = [0, 16], sizes = [5, 8], strides = [1, 1]} : vector<5x96xf32> to vector<5x8xf32>
    %45 = arith.truncf %44 : vector<5x8xf32> to vector<5x8xbf16>
    %46 = vector.extract_strided_slice %1 {offsets = [0, 48], sizes = [5, 8], strides = [1, 1]} : vector<5x96xf32> to vector<5x8xf32>
    %47 = arith.truncf %46 : vector<5x8xf32> to vector<5x8xbf16>
    %48 = vector.extract_strided_slice %1 {offsets = [0, 80], sizes = [5, 8], strides = [1, 1]} : vector<5x96xf32> to vector<5x8xf32>
    %49 = arith.truncf %48 : vector<5x8xf32> to vector<5x8xbf16>
    %cst_11 = arith.constant dense<0.000000e+00> : vector<5x5xf32>
    %50 = tpu.matmul %45, %47, %cst_11 {dimension_numbers = #tpu.dot_dimension_numbers<[1], [1], [0], [0], [0, 0, 1, 0], [], []>} : vector<5x8xbf16>, vector<5x8xbf16>, vector<5x5xf32> -> vector<5x5xf32>
    %cst_12 = arith.constant 0.353553385 : f32
    %51 = vector.broadcast %cst_12 : f32 to vector<5x5xf32>
    %52 = arith.mulf %50, %51 : vector<5x5xf32>
    %cst_13 = arith.constant dense<0xFF800000> : vector<5xf32>
    %53 = vector.multi_reduction <maximumf>, %52, %cst_13 [1] : vector<5x5xf32> to vector<5xf32>
    %54 = vector.shape_cast %53 : vector<5xf32> to vector<5x1xf32>
    %55 = vector.broadcast %54 : vector<5x1xf32> to vector<5x5xf32>
    %56 = arith.subf %52, %55 : vector<5x5xf32>
    %57 = math.exp %56 : vector<5x5xf32>
    %cst_14 = arith.constant dense<0.000000e+00> : vector<5xf32>
    %58 = vector.multi_reduction <add>, %57, %cst_14 [1] : vector<5x5xf32> to vector<5xf32>
    %59 = vector.shape_cast %58 : vector<5xf32> to vector<5x1xf32>
    %60 = tpu.reciprocal %59 {approx = true} : vector<5x1xf32> -> vector<5x1xf32>
    %61 = vector.broadcast %60 : vector<5x1xf32> to vector<5x5xf32>
    %62 = arith.mulf %57, %61 : vector<5x5xf32>
    %63 = arith.truncf %62 : vector<5x5xf32> to vector<5x5xbf16>
    %cst_15 = arith.constant dense<0.000000e+00> : vector<5x8xf32>
    %64 = tpu.matmul %63, %49, %cst_15 {dimension_numbers = #tpu.dot_dimension_numbers<[1], [0], [0], [1], [0, 0, 1, 1], [], []>} : vector<5x5xbf16>, vector<5x8xbf16>, vector<5x8xf32> -> vector<5x8xf32>
    %65 = vector.extract_strided_slice %1 {offsets = [0, 24], sizes = [5, 8], strides = [1, 1]} : vector<5x96xf32> to vector<5x8xf32>
    %66 = arith.truncf %65 : vector<5x8xf32> to vector<5x8xbf16>
    %67 = vector.extract_strided_slice %1 {offsets = [0, 56], sizes = [5, 8], strides = [1, 1]} : vector<5x96xf32> to vector<5x8xf32>
    %68 = arith.truncf %67 : vector<5x8xf32> to vector<5x8xbf16>
    %69 = vector.extract_strided_slice %1 {offsets = [0, 88], sizes = [5, 8], strides = [1, 1]} : vector<5x96xf32> to vector<5x8xf32>
    %70 = arith.truncf %69 : vector<5x8xf32> to vector<5x8xbf16>
    %cst_16 = arith.constant dense<0.000000e+00> : vector<5x5xf32>
    %71 = tpu.matmul %66, %68, %cst_16 {dimension_numbers = #tpu.dot_dimension_numbers<[1], [1], [0], [0], [0, 0, 1, 0], [], []>} : vector<5x8xbf16>, vector<5x8xbf16>, vector<5x5xf32> -> vector<5x5xf32>
    %cst_17 = arith.constant 0.353553385 : f32
    %72 = vector.broadcast %cst_17 : f32 to vector<5x5xf32>
    %73 = arith.mulf %71, %72 : vector<5x5xf32>
    %cst_18 = arith.constant dense<0xFF800000> : vector<5xf32>
    %74 = vector.multi_reduction <maximumf>, %73, %cst_18 [1] : vector<5x5xf32> to vector<5xf32>
    %75 = vector.shape_cast %74 : vector<5xf32> to vector<5x1xf32>
    %76 = vector.broadcast %75 : vector<5x1xf32> to vector<5x5xf32>
    %77 = arith.subf %73, %76 : vector<5x5xf32>
    %78 = math.exp %77 : vector<5x5xf32>
    %cst_19 = arith.constant dense<0.000000e+00> : vector<5xf32>
    %79 = vector.multi_reduction <add>, %78, %cst_19 [1] : vector<5x5xf32> to vector<5xf32>
    %80 = vector.shape_cast %79 : vector<5xf32> to vector<5x1xf32>
    %81 = tpu.reciprocal %80 {approx = true} : vector<5x1xf32> -> vector<5x1xf32>
    %82 = vector.broadcast %81 : vector<5x1xf32> to vector<5x5xf32>
    %83 = arith.mulf %78, %82 : vector<5x5xf32>
    %84 = arith.truncf %83 : vector<5x5xf32> to vector<5x5xbf16>
    %cst_20 = arith.constant dense<0.000000e+00> : vector<5x8xf32>
    %85 = tpu.matmul %84, %70, %cst_20 {dimension_numbers = #tpu.dot_dimension_numbers<[1], [0], [0], [1], [0, 0, 1, 1], [], []>} : vector<5x5xbf16>, vector<5x8xbf16>, vector<5x8xf32> -> vector<5x8xf32>
    %86 = tpu.concatenate %22, %43, %64, %85 in 1 : vector<5x8xf32>, vector<5x8xf32>, vector<5x8xf32>, vector<5x8xf32> -> vector<5x32xf32>
    %87 = arith.truncf %86 : vector<5x32xf32> to vector<5x32xbf16>
    %c0_21 = arith.constant 0 : index
    %c0_22 = arith.constant 0 : index
    %c0_23 = arith.constant 0 : index
    %88 = vector.load %arg2[%c0_21, %c0_22, %c0_23] : memref<1x5x32xbf16, #tpu.memory_space<vmem>>, vector<1x5x32xbf16>
    %89 = vector.shape_cast %88 : vector<1x5x32xbf16> to vector<5x32xbf16>
    %90 = vector.shape_cast %87 : vector<5x32xbf16> to vector<1x5x32xbf16>
    tpu.vector_store %arg2[%c0_21, %c0_22, %c0_23], %90 {strides = array<i32>} : memref<1x5x32xbf16, #tpu.memory_space<vmem>>, vector<1x5x32xbf16>,
    return
  }
  func.func @transform_0(%arg0: i32) -> (i32, i32, i32) {
    %c0_i32 = arith.constant 0 : i32
    %c0_i32_0 = arith.constant 0 : i32
    %c0_i32_1 = arith.constant 0 : i32
    return %arg0, %c0_i32, %c0_i32_0 : i32, i32, i32
  }
  func.func @transform_1(%arg0: i32) -> (i32, i32, i32) {
    %c0_i32 = arith.constant 0 : i32
    %c0_i32_0 = arith.constant 0 : i32
    %c0_i32_1 = arith.constant 0 : i32
    return %arg0, %c0_i32, %c0_i32_0 : i32, i32, i32
  }
}

module attributes {stable_mosaic.version = 11 : i64} {
  func.func @_layernorm_kernel(%arg0: i32, %arg1: memref<10x32xf32, #tpu.memory_space<vmem>>, %arg2: memref<1x32xf32, #tpu.memory_space<vmem>>, %arg3: memref<1x32xf32, #tpu.memory_space<vmem>>, %arg4: memref<10x32xf32, #tpu.memory_space<vmem>>) attributes {dimension_semantics = [#tpu.dimension_semantics<parallel>], iteration_bounds = array<i64: 1>, scalar_prefetch = 0 : i64, scratch_operands = 0 : i64, tpu.core_type = #tpu.core_type<tc>, window_params = [{transform_indices = @transform_0, window_bounds = array<i64: 10, 32>}, {pipeline_mode = #tpu.pipeline_mode<synchronous>, transform_indices = @transform_1, window_bounds = array<i64: 1, 32>}, {pipeline_mode = #tpu.pipeline_mode<synchronous>, transform_indices = @transform_2, window_bounds = array<i64: 1, 32>}, {transform_indices = @transform_3, window_bounds = array<i64: 10, 32>}]} {
    %c0 = arith.constant 0 : index
    %c0_0 = arith.constant 0 : index
    %0 = vector.load %arg1[%c0, %c0_0] : memref<10x32xf32, #tpu.memory_space<vmem>>, vector<10x32xf32>
    %c0_1 = arith.constant 0 : index
    %c0_2 = arith.constant 0 : index
    %1 = vector.load %arg2[%c0_1, %c0_2] : memref<1x32xf32, #tpu.memory_space<vmem>>, vector<1x32xf32>
    %c0_3 = arith.constant 0 : index
    %c0_4 = arith.constant 0 : index
    %2 = vector.load %arg3[%c0_3, %c0_4] : memref<1x32xf32, #tpu.memory_space<vmem>>, vector<1x32xf32>
    %cst = arith.constant dense<0.000000e+00> : vector<10xf32>
    %3 = vector.multi_reduction <add>, %0, %cst [1] : vector<10x32xf32> to vector<10xf32>
    %4 = vector.shape_cast %3 : vector<10xf32> to vector<10x1xf32>
    %cst_5 = arith.constant 3.200000e+01 : f32
    %5 = vector.broadcast %cst_5 : f32 to vector<10x1xf32>
    %6 = arith.divf %4, %5 : vector<10x1xf32>
    %7 = vector.broadcast %6 : vector<10x1xf32> to vector<10x32xf32>
    %8 = arith.subf %0, %7 : vector<10x32xf32>
    %9 = arith.mulf %8, %8 : vector<10x32xf32>
    %cst_6 = arith.constant dense<0.000000e+00> : vector<10xf32>
    %10 = vector.multi_reduction <add>, %9, %cst_6 [1] : vector<10x32xf32> to vector<10xf32>
    %11 = vector.shape_cast %10 : vector<10xf32> to vector<10x1xf32>
    %cst_7 = arith.constant 3.200000e+01 : f32
    %12 = vector.broadcast %cst_7 : f32 to vector<10x1xf32>
    %13 = arith.divf %11, %12 : vector<10x1xf32>
    %cst_8 = arith.constant 9.99999997E-7 : f32
    %14 = vector.broadcast %cst_8 : f32 to vector<10x1xf32>
    %15 = arith.addf %13, %14 : vector<10x1xf32>
    %16 = math.rsqrt %15 : vector<10x1xf32>
    %17 = vector.broadcast %16 : vector<10x1xf32> to vector<10x32xf32>
    %18 = arith.mulf %8, %17 : vector<10x32xf32>
    %19 = vector.broadcast %1 : vector<1x32xf32> to vector<10x32xf32>
    %20 = arith.mulf %18, %19 : vector<10x32xf32>
    %21 = vector.broadcast %2 : vector<1x32xf32> to vector<10x32xf32>
    %22 = arith.addf %20, %21 : vector<10x32xf32>
    %c0_9 = arith.constant 0 : index
    %c0_10 = arith.constant 0 : index
    %23 = vector.load %arg4[%c0_9, %c0_10] : memref<10x32xf32, #tpu.memory_space<vmem>>, vector<10x32xf32>
    tpu.vector_store %arg4[%c0_9, %c0_10], %22 {strides = array<i32>} : memref<10x32xf32, #tpu.memory_space<vmem>>, vector<10x32xf32>,
    return
  }
  func.func @transform_0(%arg0: i32) -> (i32, i32) {
    %c0_i32 = arith.constant 0 : i32
    %c0_i32_0 = arith.constant 0 : i32
    return %arg0, %c0_i32 : i32, i32
  }
  func.func @transform_1(%arg0: i32) -> (i32, i32) {
    %c0_i32 = arith.constant 0 : i32
    %c0_i32_0 = arith.constant 0 : i32
    %c0_i32_1 = arith.constant 0 : i32
    return %c0_i32, %c0_i32_0 : i32, i32
  }
  func.func @transform_2(%arg0: i32) -> (i32, i32) {
    %c0_i32 = arith.constant 0 : i32
    %c0_i32_0 = arith.constant 0 : i32
    %c0_i32_1 = arith.constant 0 : i32
    return %c0_i32, %c0_i32_0 : i32, i32
  }
  func.func @transform_3(%arg0: i32) -> (i32, i32) {
    %c0_i32 = arith.constant 0 : i32
    %c0_i32_0 = arith.constant 0 : i32
    return %arg0, %c0_i32 : i32, i32
  }
}

module attributes {stable_mosaic.version = 11 : i64} {
  func.func @_ln_mlp_kernel(%arg0: i32, %arg1: memref<10x32xf32, #tpu.memory_space<vmem>>, %arg2: memref<1x32xf32, #tpu.memory_space<vmem>>, %arg3: memref<1x32xf32, #tpu.memory_space<vmem>>, %arg4: memref<32x128xbf16, #tpu.memory_space<vmem>>, %arg5: memref<1x128xf32, #tpu.memory_space<vmem>>, %arg6: memref<128x32xbf16, #tpu.memory_space<vmem>>, %arg7: memref<1x32xf32, #tpu.memory_space<vmem>>, %arg8: memref<10x32xf32, #tpu.memory_space<vmem>>) attributes {dimension_semantics = [#tpu.dimension_semantics<parallel>], iteration_bounds = array<i64: 1>, scalar_prefetch = 0 : i64, scratch_operands = 0 : i64, tpu.core_type = #tpu.core_type<tc>, window_params = [{transform_indices = @transform_0, window_bounds = array<i64: 10, 32>}, {pipeline_mode = #tpu.pipeline_mode<synchronous>, transform_indices = @transform_1, window_bounds = array<i64: 1, 32>}, {pipeline_mode = #tpu.pipeline_mode<synchronous>, transform_indices = @transform_2, window_bounds = array<i64: 1, 32>}, {pipeline_mode = #tpu.pipeline_mode<synchronous>, transform_indices = @transform_3, window_bounds = array<i64: 32, 128>}, {pipeline_mode = #tpu.pipeline_mode<synchronous>, transform_indices = @transform_4, window_bounds = array<i64: 1, 128>}, {pipeline_mode = #tpu.pipeline_mode<synchronous>, transform_indices = @transform_5, window_bounds = array<i64: 128, 32>}, {pipeline_mode = #tpu.pipeline_mode<synchronous>, transform_indices = @transform_6, window_bounds = array<i64: 1, 32>}, {transform_indices = @transform_7, window_bounds = array<i64: 10, 32>}]} {
    %c0 = arith.constant 0 : index
    %c0_0 = arith.constant 0 : index
    %0 = vector.load %arg1[%c0, %c0_0] : memref<10x32xf32, #tpu.memory_space<vmem>>, vector<10x32xf32>
    %c0_1 = arith.constant 0 : index
    %c0_2 = arith.constant 0 : index
    %1 = vector.load %arg2[%c0_1, %c0_2] : memref<1x32xf32, #tpu.memory_space<vmem>>, vector<1x32xf32>
    %c0_3 = arith.constant 0 : index
    %c0_4 = arith.constant 0 : index
    %2 = vector.load %arg3[%c0_3, %c0_4] : memref<1x32xf32, #tpu.memory_space<vmem>>, vector<1x32xf32>
    %cst = arith.constant dense<0.000000e+00> : vector<10xf32>
    %3 = vector.multi_reduction <add>, %0, %cst [1] : vector<10x32xf32> to vector<10xf32>
    %4 = vector.shape_cast %3 : vector<10xf32> to vector<10x1xf32>
    %cst_5 = arith.constant 3.200000e+01 : f32
    %5 = vector.broadcast %cst_5 : f32 to vector<10x1xf32>
    %6 = arith.divf %4, %5 : vector<10x1xf32>
    %7 = vector.broadcast %6 : vector<10x1xf32> to vector<10x32xf32>
    %8 = arith.subf %0, %7 : vector<10x32xf32>
    %9 = arith.mulf %8, %8 : vector<10x32xf32>
    %cst_6 = arith.constant dense<0.000000e+00> : vector<10xf32>
    %10 = vector.multi_reduction <add>, %9, %cst_6 [1] : vector<10x32xf32> to vector<10xf32>
    %11 = vector.shape_cast %10 : vector<10xf32> to vector<10x1xf32>
    %cst_7 = arith.constant 3.200000e+01 : f32
    %12 = vector.broadcast %cst_7 : f32 to vector<10x1xf32>
    %13 = arith.divf %11, %12 : vector<10x1xf32>
    %cst_8 = arith.constant 9.99999997E-7 : f32
    %14 = vector.broadcast %cst_8 : f32 to vector<10x1xf32>
    %15 = arith.addf %13, %14 : vector<10x1xf32>
    %16 = math.rsqrt %15 : vector<10x1xf32>
    %17 = vector.broadcast %16 : vector<10x1xf32> to vector<10x32xf32>
    %18 = arith.mulf %8, %17 : vector<10x32xf32>
    %19 = vector.broadcast %1 : vector<1x32xf32> to vector<10x32xf32>
    %20 = arith.mulf %18, %19 : vector<10x32xf32>
    %21 = vector.broadcast %2 : vector<1x32xf32> to vector<10x32xf32>
    %22 = arith.addf %20, %21 : vector<10x32xf32>
    %23 = arith.truncf %22 : vector<10x32xf32> to vector<10x32xbf16>
    %c0_9 = arith.constant 0 : index
    %c0_10 = arith.constant 0 : index
    %24 = vector.load %arg4[%c0_9, %c0_10] : memref<32x128xbf16, #tpu.memory_space<vmem>>, vector<32x128xbf16>
    %cst_11 = arith.constant dense<0.000000e+00> : vector<10x128xf32>
    %25 = tpu.matmul %23, %24, %cst_11 {dimension_numbers = #tpu.dot_dimension_numbers<[1], [0], [0], [1], [0, 0, 1, 1], [], []>} : vector<10x32xbf16>, vector<32x128xbf16>, vector<10x128xf32> -> vector<10x128xf32>
    %c0_12 = arith.constant 0 : index
    %c0_13 = arith.constant 0 : index
    %26 = vector.load %arg5[%c0_12, %c0_13] : memref<1x128xf32, #tpu.memory_space<vmem>>, vector<1x128xf32>
    %27 = vector.broadcast %26 : vector<1x128xf32> to vector<10x128xf32>
    %28 = arith.addf %25, %27 : vector<10x128xf32>
    %cst_14 = arith.constant 5.000000e-01 : f32
    %29 = vector.broadcast %cst_14 : f32 to vector<10x128xf32>
    %30 = arith.mulf %29, %28 : vector<10x128xf32>
    %cst_15 = arith.constant 4.471500e-02 : f32
    %31 = vector.broadcast %cst_15 : f32 to vector<10x128xf32>
    %32 = arith.mulf %31, %28 : vector<10x128xf32>
    %33 = arith.mulf %32, %28 : vector<10x128xf32>
    %34 = arith.mulf %33, %28 : vector<10x128xf32>
    %35 = arith.addf %28, %34 : vector<10x128xf32>
    %cst_16 = arith.constant 0.797884583 : f32
    %36 = vector.broadcast %cst_16 : f32 to vector<10x128xf32>
    %37 = arith.mulf %36, %35 : vector<10x128xf32>
    %38 = math.tanh %37 : vector<10x128xf32>
    %cst_17 = arith.constant 1.000000e+00 : f32
    %39 = vector.broadcast %cst_17 : f32 to vector<10x128xf32>
    %40 = arith.addf %39, %38 : vector<10x128xf32>
    %41 = arith.mulf %30, %40 : vector<10x128xf32>
    %42 = arith.truncf %41 : vector<10x128xf32> to vector<10x128xbf16>
    %c0_18 = arith.constant 0 : index
    %c0_19 = arith.constant 0 : index
    %43 = vector.load %arg6[%c0_18, %c0_19] : memref<128x32xbf16, #tpu.memory_space<vmem>>, vector<128x32xbf16>
    %cst_20 = arith.constant dense<0.000000e+00> : vector<10x32xf32>
    %44 = tpu.matmul %42, %43, %cst_20 {dimension_numbers = #tpu.dot_dimension_numbers<[1], [0], [0], [1], [0, 0, 1, 1], [], []>} : vector<10x128xbf16>, vector<128x32xbf16>, vector<10x32xf32> -> vector<10x32xf32>
    %45 = arith.addf %0, %44 : vector<10x32xf32>
    %c0_21 = arith.constant 0 : index
    %c0_22 = arith.constant 0 : index
    %46 = vector.load %arg7[%c0_21, %c0_22] : memref<1x32xf32, #tpu.memory_space<vmem>>, vector<1x32xf32>
    %47 = vector.broadcast %46 : vector<1x32xf32> to vector<10x32xf32>
    %48 = arith.addf %45, %47 : vector<10x32xf32>
    %c0_23 = arith.constant 0 : index
    %c0_24 = arith.constant 0 : index
    %49 = vector.load %arg8[%c0_23, %c0_24] : memref<10x32xf32, #tpu.memory_space<vmem>>, vector<10x32xf32>
    tpu.vector_store %arg8[%c0_23, %c0_24], %48 {strides = array<i32>} : memref<10x32xf32, #tpu.memory_space<vmem>>, vector<10x32xf32>,
    return
  }
  func.func @transform_0(%arg0: i32) -> (i32, i32) {
    %c0_i32 = arith.constant 0 : i32
    %c0_i32_0 = arith.constant 0 : i32
    return %arg0, %c0_i32 : i32, i32
  }
  func.func @transform_1(%arg0: i32) -> (i32, i32) {
    %c0_i32 = arith.constant 0 : i32
    %c0_i32_0 = arith.constant 0 : i32
    %c0_i32_1 = arith.constant 0 : i32
    return %c0_i32, %c0_i32_0 : i32, i32
  }
  func.func @transform_2(%arg0: i32) -> (i32, i32) {
    %c0_i32 = arith.constant 0 : i32
    %c0_i32_0 = arith.constant 0 : i32
    %c0_i32_1 = arith.constant 0 : i32
    return %c0_i32, %c0_i32_0 : i32, i32
  }
  func.func @transform_3(%arg0: i32) -> (i32, i32) {
    %c0_i32 = arith.constant 0 : i32
    %c0_i32_0 = arith.constant 0 : i32
    %c0_i32_1 = arith.constant 0 : i32
    return %c0_i32, %c0_i32_0 : i32, i32
  }
  func.func @transform_4(%arg0: i32) -> (i32, i32) {
    %c0_i32 = arith.constant 0 : i32
    %c0_i32_0 = arith.constant 0 : i32
    %c0_i32_1 = arith.constant 0 : i32
    return %c0_i32, %c0_i32_0 : i32, i32
  }
  func.func @transform_5(%arg0: i32) -> (i32, i32) {
    %c0_i32 = arith.constant 0 : i32
    %c0_i32_0 = arith.constant 0 : i32
    %c0_i32_1 = arith.constant 0 : i32
    return %c0_i32, %c0_i32_0 : i32, i32
  }
  func.func @transform_6(%arg0: i32) -> (i32, i32) {
    %c0_i32 = arith.constant 0 : i32
    %c0_i32_0 = arith.constant 0 : i32
    %c0_i32_1 = arith.constant 0 : i32
    return %c0_i32, %c0_i32_0 : i32, i32
  }
  func.func @transform_7(%arg0: i32) -> (i32, i32) {
    %c0_i32 = arith.constant 0 : i32
    %c0_i32_0 = arith.constant 0 : i32
    return %arg0, %c0_i32 : i32, i32
  }
}

</mosaic_0001>

<bundles_post_ra>
// kernel: _lambda_.13
= control target key start
LH: loop header
LB: loop body
LE: loop exit
PB: predicated region body
PF: predicated region fallthrough
CT: control target
= control target key end

     0   :  { %9 = vsyncpa [#allocation3], 0  ;;  %s437_s0 = inlined_call_operand.hbm [shape: bf16[10,32], index: 0, kind: input, shape index: {}]   ;;  %s438_s1 = inlined_call_operand.hbm [shape: bf16[32,32], index: 1, kind: input, shape index: {}]   ;;  %s439_s2 = inlined_call_operand.hbm [shape: f32[1,32], index: 2, kind: input, shape index: {}]   ;;  %s440_s3 = inlined_call_operand.hbm [shape: f32[10,32], index: 3, kind: input, shape index: {}]   ;;  %s441_s4 = inlined_call_operand.hbm [shape: f32[10,32], index: 4, kind: output, shape index: {}]  }
   0x1   :  { %10 = vsyncpa [#allocation6], 0 }
   0x2   :  { %11 = vsyncpa [#allocation9], 0 }
   0x3   :  { %12 = vsyncpa [#allocation4], 0  ;;  %s321_s15 = smov [#allocation5]   ;;  %s322_s17 = smov [#allocation2]  }
   0x4   :  { %s30_s16 = sshll.u32 %s321_s15, 4  ;;  %s18_s18 = sshll.u32 %s322_s17, 4  ;;  %s31_s16 = int_to_ptr.vmem [resolvable:$true] %s30_s16  ;;  %s357_s18 = int_to_ptr.vmem [resolvable:$true] %s18_s18 }
   0x5   :  { %s203_s21 = scalar_lea.hbm %s438_s1, 256 }
   0x6   :  { %p204_p0 = scmp.ne.s32.totalorder %s438_s1, %s203_s21  ;;  %p207_p1 = scmp.lt.u32.totalorder %s203_s21, %s438_s1 }
   0x8   :  { %p209_p2 = pnand %p207_p1, %p204_p0 }
   0xa   :  { %212 = shalt.err (!%p209_p2)
}
   0xb   :  { %s213_s26 = scalar_lea.vmem %s31_s16, 256  ;;  %p218_p4 = scmp.lt.s32.totalorder %s31_s16, %s31_s16 }
   0xc   :  { %p214_p3 = scmp.ne.s32.totalorder %s31_s16, %s213_s26  ;;  %p219_p5 = scmp.lt.s32.totalorder %s213_s26, %s213_s26 }
   0xe   :  { %p220_p6 = por %p219_p5, %p218_p4 }
  0x10   :  { %p221_p7 = pnand %p220_p6, %p214_p3 }
  0x12   :  { %224 = shalt.err (!%p221_p7)
}
  0x13   :  { %s323_s27 = smov 64   ;;  %s324_s28 = smov 4  }
  0x14   :  { %36 = dma.hbm_to_vmem [thread:$0]  %s438_s1, 256, %s31_s16, [#allocation6], %s323_s27, %s323_s27, %s324_s28  }
  0x15   :  { %s225_s7 = scalar_lea.hbm %s437_s0, 128 }
  0x16   :  { %p226_p8 = scmp.ne.s32.totalorder %s437_s0, %s225_s7  ;;  %p229_p9 = scmp.lt.u32.totalorder %s225_s7, %s437_s0 }
  0x18   :  { %p231_p10 = pnand %p229_p9, %p226_p8 }
  0x1a   :  { %234 = shalt.err (!%p231_p10)
}
  0x1b   :  { %s235_s12 = scalar_lea.vmem %s357_s18, 128  ;;  %p240_p12 = scmp.lt.s32.totalorder %s357_s18, %s357_s18 }
  0x1c   :  { %p236_p11 = scmp.ne.s32.totalorder %s357_s18, %s235_s12  ;;  %p241_p13 = scmp.lt.s32.totalorder %s235_s12, %s235_s12 }
  0x1e   :  { %p242_p0 = por %p241_p13, %p240_p12 }
  0x20   :  { %p243_p1 = pnand %p242_p0, %p236_p11 }
  0x22   :  { %246 = shalt.err (!%p243_p1)
}
  0x23   :  { %24 = dma.hbm_to_vmem [thread:$0]  %s437_s0, 128, %s357_s18, [#allocation3], %s323_s27, %s323_s27, %s324_s28  }
  0x24   :  { %s325_s14 = smov [#allocation7]   ;;  %s326_s16 = smov [#allocation8]  }
  0x25   :  { %s43_s15 = sshll.u32 %s325_s14, 4  ;;  %s52_s17 = sshll.u32 %s326_s16, 4  ;;  %s44_s15 = int_to_ptr.vmem [resolvable:$true] %s43_s15  ;;  %s388_s17 = int_to_ptr.vmem [resolvable:$true] %s52_s17 }
  0x26   :  { %s247_s21 = scalar_lea.hbm %s439_s2, 16 }
  0x27   :  { %p248_p2 = scmp.ne.s32.totalorder %s439_s2, %s247_s21  ;;  %p251_p3 = scmp.lt.u32.totalorder %s247_s21, %s439_s2 }
  0x29   :  { %p253_p4 = pnand %p251_p3, %p248_p2 }
  0x2b   :  { %256 = shalt.err (!%p253_p4)
}
  0x2c   :  { %s257_s0 = scalar_lea.vmem %s44_s15, 16  ;;  %s261_s18 = scalar_lea.vmem %s44_s15, 32 }
  0x2d   :  { %p258_p5 = scmp.ne.s32.totalorder %s44_s15, %s257_s0  ;;  %p262_p6 = scmp.lt.s32.totalorder %s44_s15, %s44_s15 }
  0x2e   :  { %p263_p7 = scmp.lt.s32.totalorder %s261_s18, %s257_s0 }
  0x30   :  { %p264_p8 = por %p263_p7, %p262_p6 }
  0x32   :  { %p265_p9 = pnand %p264_p8, %p258_p5 }
  0x34   :  { %268 = shalt.err (!%p265_p9)
}
  0x35   :  { %46 = dma.hbm_to_vmem [thread:$0]  %s439_s2, 16, %s44_s15, [#allocation6]  }
  0x36   :  { %s269_s30 = scalar_lea.hbm %s440_s3, 256 }
  0x37   :  { %p270_p10 = scmp.ne.s32.totalorder %s440_s3, %s269_s30  ;;  %p273_p11 = scmp.lt.u32.totalorder %s269_s30, %s440_s3 }
  0x39   :  { %p275_p12 = pnand %p273_p11, %p270_p10 }
  0x3b   :  { %278 = shalt.err (!%p275_p12)
}
  0x3c   :  { %s279_s9 = scalar_lea.vmem %s388_s17, 256  ;;  %p284_p0 = scmp.lt.s32.totalorder %s388_s17, %s388_s17 }
  0x3d   :  { %p280_p13 = scmp.ne.s32.totalorder %s388_s17, %s279_s9  ;;  %p285_p1 = scmp.lt.s32.totalorder %s279_s9, %s279_s9 }
  0x3f   :  { %p286_p2 = por %p285_p1, %p284_p0 }
  0x41   :  { %p287_p3 = pnand %p286_p2, %p280_p13 }
  0x43   :  { %290 = shalt.err (!%p287_p3)
}
  0x44   :  { %s327_s2 = smov 128   ;;  %s328_s10 = smov 8  }
  0x45   :  { %58 = dma.hbm_to_vmem [thread:$0]  %s440_s3, 256, %s388_s17, [#allocation9], %s327_s2, %s327_s2, %s328_s10  }
  0x46   :  { %313 = dma.done.wait [#allocation3], 128  }
  0x47   :  { %314 = vsyncadd [#allocation3], 4294967168 }
  0x48   :  { %315 = dma.done.wait [#allocation6], 272  }
  0x49   :  { %316 = vsyncadd [#allocation6], 4294967024 }
  0x4a   :  { %317 = dma.done.wait [#allocation9], 256  }
  0x4b   :  { %318 = vsyncadd [#allocation9], 4294967040  ;;  %v329_v0 = vmov 0.0   ;;  %vm330_vm0 = vmmov 0   ;;  %v200_v1 = vld [vmem:[#allocation5] sm:$0xff]   ;;  %v201_v2 = vld [vmem:[#allocation5 + $0x8] sm:$0xff]  }
  0x4c   :  { %181 = vmatprep.subr.bf16.mxu0 %v329_v0  ;;  %185 = vmatprep.mubr.msk.bf16.mxu0 %vm330_vm0, %v329_v0  ;;  %v202_v3 = vld [vmem:[#allocation2] sm:$0x1f]   ;;  %vm102_vm1 = vcmask 261120   ;;  %v173_v4 = vld [vmem:[#allocation7] ss:$0 sm:$0xff]  ;;  %s331_s3 = smov [#allocation10]  }
  0x4d   :  { %182 = vmatpush3.bf16.msra.mxu0 %v200_v1  ;;  %v147_v6 = vld [vmem:[#allocation8] sm:$0xff]  ;;  %v148_v10 = vld [vmem:[#allocation8 + $0x8] sm:$0x3]  ;;  %s159_s1 = sshll.u32 %s331_s3, 4  ;;  %vm152_vm2 = vcmask 254976   ;;  %s160_s1 = int_to_ptr.vmem [resolvable:$true] %s159_s1 }
  0x4e   :  { %183 = vmatprep.subr.bf16.mxu0 %v329_v0  ;;  %s291_s13 = scalar_lea.vmem %s160_s1, 256  ;;  %p296_p5 = scmp.lt.s32.totalorder %s160_s1, %s160_s1 }
  0x4f   :  { %p292_p4 = scmp.ne.s32.totalorder %s160_s1, %s291_s13  ;;  %p297_p6 = scmp.lt.s32.totalorder %s291_s13, %s291_s13 }
  0x51   :  { %184 = vmatpush3.bf16.msra.mxu0 %v201_v2  ;;  %p298_p7 = por %p297_p6, %p296_p5 }
  0x53   :  { %p299_p8 = pnand %p298_p7, %p292_p4 }
  0x54   :  { %186 = vmatmul.mubr.msk.bf16.vlgmr.msra.gmra.mrb[0].mxu0 %vm102_vm1, %v202_v3 }
 0x127   :  { %v140_v5 = vpop.f32.mrb[0].mxu0 }
 0x128   :  { %v141_v7 = vadd.f32 %v173_v4, %v140_v5  ;;  %v187_v8 = vpop.f32.mrb[1].mxu0 }
 0x129   :  { %v143_v9 = vpop.f32.mrb[2].mxu0 }
 0x12a   :  { %v149_v11 = vadd.f32 %v147_v6, %v141_v7  ;;  %v144_v12 = vadd.f32 %v173_v4, %v143_v9  ;;  %v188_v13 = vpop.f32.mrb[3].mxu0 }
 0x12c   :  { %151 = vst.msk [vmem:[#allocation10] sm:$0xff] %vm102_vm1, %v149_v11  ;;  %v150_v14 = vadd.f32 %v148_v10, %v144_v12 }
 0x12e   :  { %153 = vst.msk [vmem:[#allocation10 + $0x8] sm:$0x3] %vm152_vm2, %v150_v14 }
 0x12f   :  { %302 = shalt.err (!%p299_p8)
}
 0x130   :  { %s303_s16 = scalar_lea.hbm %s441_s4, 256 }
 0x131   :  { %p304_p9 = scmp.ne.s32.totalorder %s441_s4, %s303_s16  ;;  %p307_p10 = scmp.lt.u32.totalorder %s303_s16, %s441_s4 }
 0x133   :  { %p309_p11 = pnand %p307_p10, %p304_p9 }
 0x135   :  { %312 = shalt.err (!%p309_p11)
}
 0x136   :  { %165 = dma.vmem_to_hbm [thread:$0]  %s160_s1, 256, %s441_s4, [#allocation4], %s327_s2, %s327_s2, %s328_s10  }
 0x137   :  { %319 = dma.done.wait [#allocation4], 256  }
 0x138   :  { %320 = vsyncadd [#allocation4], 4294967040 }
 0x139   :  { %169 = vsyncpa [#allocation3], 1 }
 0x13a   :  { %170 = vsyncpa [#allocation6], 1 }
 0x13b   :  { %171 = vsyncpa [#allocation9], 1 }
 0x13c   :  { %172 = vsyncpa [#allocation4], 1 }

// kernel: _lambda_.10
= control target key start
LH: loop header
LB: loop body
LE: loop exit
PB: predicated region body
PF: predicated region fallthrough
CT: control target
= control target key end

     0   :  { %8 = vsyncpa [#allocation3], 0  ;;  %s431_s0 = inlined_call_operand.hbm [shape: bf16[8,192], index: 0, kind: input, shape index: {}]   ;;  %s432_s1 = inlined_call_operand.hbm [shape: bf16[192,32], index: 1, kind: input, shape index: {}]   ;;  %s433_s2 = inlined_call_operand.hbm [shape: f32[1,32], index: 2, kind: input, shape index: {}]   ;;  %s434_s3 = inlined_call_operand.hbm [shape: f32[8,32], index: 3, kind: output, shape index: {}]  }
   0x1   :  { %9 = vsyncpa [#allocation6], 0 }
   0x2   :  { %10 = vsyncpa [#allocation4], 0  ;;  %s356_s12 = smov [#allocation5]   ;;  %s262_s16 = scalar_lea.hbm %s432_s1, 1536 }
   0x3   :  { %s26_s13 = sshll.u32 %s356_s12, 4  ;;  %p263_p0 = scmp.ne.s32.totalorder %s432_s1, %s262_s16  ;;  %s27_s13 = int_to_ptr.vmem [resolvable:$true] %s26_s13 }
   0x4   :  { %p266_p1 = scmp.lt.u32.totalorder %s262_s16, %s432_s1 }
   0x6   :  { %p268_p2 = pnand %p266_p1, %p263_p0 }
   0x8   :  { %271 = shalt.err (!%p268_p2)
}
   0x9   :  { %s272_s21 = scalar_lea.vmem %s27_s13, 1536  ;;  %p277_p4 = scmp.lt.s32.totalorder %s27_s13, %s27_s13 }
   0xa   :  { %p273_p3 = scmp.ne.s32.totalorder %s27_s13, %s272_s21  ;;  %p278_p5 = scmp.lt.s32.totalorder %s272_s21, %s272_s21 }
   0xc   :  { %p279_p6 = por %p278_p5, %p277_p4 }
   0xe   :  { %p280_p7 = pnand %p279_p6, %p273_p3 }
  0x10   :  { %283 = shalt.err (!%p280_p7)
}
  0x11   :  { %s357_s22 = smov 64   ;;  %s358_s23 = smov 4  }
  0x12   :  { %32 = dma.hbm_to_vmem [thread:$0]  %s432_s1, 1536, %s27_s13, [#allocation6], %s357_s22, %s357_s22, %s358_s23  }
  0x13   :  { %s359_s26 = smov [#allocation2]   ;;  %s360_s28 = smov [#allocation7]  }
  0x14   :  { %s17_s27 = sshll.u32 %s359_s26, 4  ;;  %s39_s29 = sshll.u32 %s360_s28, 4  ;;  %s18_s27 = int_to_ptr.vmem [resolvable:$true] %s17_s27  ;;  %s40_s29 = int_to_ptr.vmem [resolvable:$true] %s39_s29 }
  0x15   :  { %s284_s5 = scalar_lea.hbm %s431_s0, 128 }
  0x16   :  { %p285_p8 = scmp.ne.s32.totalorder %s431_s0, %s284_s5  ;;  %p288_p9 = scmp.lt.u32.totalorder %s284_s5, %s431_s0 }
  0x18   :  { %p290_p10 = pnand %p288_p9, %p285_p8 }
  0x1a   :  { %293 = shalt.err (!%p290_p10)
}
  0x1b   :  { %s294_s1 = scalar_lea.vmem %s18_s27, 128  ;;  %p299_p12 = scmp.lt.s32.totalorder %s18_s27, %s18_s27 }
  0x1c   :  { %p295_p11 = scmp.ne.s32.totalorder %s18_s27, %s294_s1  ;;  %p300_p13 = scmp.lt.s32.totalorder %s294_s1, %s294_s1 }
  0x1e   :  { %p301_p0 = por %p300_p13, %p299_p12 }
  0x20   :  { %p302_p1 = pnand %p301_p0, %p295_p11 }
  0x22   :  { %305 = shalt.err (!%p302_p1)
}
  0x23   :  { %20 = dma.hbm_to_vmem [thread:$0]  %s431_s0, 128, %s18_s27, [#allocation3]  }
  0x24   :  { %s306_s14 = scalar_lea.hbm %s433_s2, 16 }
  0x25   :  { %p307_p2 = scmp.ne.s32.totalorder %s433_s2, %s306_s14  ;;  %p310_p3 = scmp.lt.u32.totalorder %s306_s14, %s433_s2 }
  0x27   :  { %p312_p4 = pnand %p310_p3, %p307_p2 }
  0x29   :  { %315 = shalt.err (!%p312_p4)
}
  0x2a   :  { %s316_s19 = scalar_lea.vmem %s40_s29, 16  ;;  %s320_s20 = scalar_lea.vmem %s40_s29, 32 }
  0x2b   :  { %p317_p5 = scmp.ne.s32.totalorder %s40_s29, %s316_s19  ;;  %p321_p6 = scmp.lt.s32.totalorder %s40_s29, %s40_s29 }
  0x2c   :  { %p322_p7 = scmp.lt.s32.totalorder %s320_s20, %s316_s19 }
  0x2e   :  { %p323_p8 = por %p322_p7, %p321_p6 }
  0x30   :  { %p324_p9 = pnand %p323_p8, %p317_p5 }
  0x32   :  { %327 = shalt.err (!%p324_p9)
}
  0x33   :  { %42 = dma.hbm_to_vmem [thread:$0]  %s433_s2, 16, %s40_s29, [#allocation6]  }
  0x34   :  { %350 = dma.done.wait [#allocation3], 128  }
  0x35   :  { %351 = vsyncadd [#allocation3], 4294967168 }
  0x36   :  { %352 = dma.done.wait [#allocation6], 1552  }
  0x37   :  { %353 = vsyncadd [#allocation6], 4294965744  ;;  %v361_v0 = vmov 0   ;;  %v248_v1 = vld [vmem:[#allocation5] sm:$0xff]   ;;  %v249_v2 = vld [vmem:[#allocation5 + $0x8] sm:$0xff]   ;;  %vm163_vm0 = vcmask 523264  }
  0x38   :  { %167 = vmatprep.subr.bf16.mxu0 %v361_v0  ;;  %v250_v3 = vld [vmem:[#allocation5 + $0x10] sm:$0xff]   ;;  %v251_v4 = vld [vmem:[#allocation5 + $0x18] sm:$0xff]   ;;  %v252_v7 = vld [vmem:[#allocation5 + $0x20] sm:$0xff]   ;;  %s362_s2 = smov [#allocation8]   ;;  %vm207_vm1 = vcmask 261120  }
  0x39   :  { %168 = vmatpush1.bf16.msra.mxu0 %v248_v1  ;;  %v53_v5 = vld [vmem:[#allocation2] sm:$0xff]  ;;  %v253_v8 = vld [vmem:[#allocation5 + $0x28] sm:$0xff]   ;;  %v254_v9 = vld [vmem:[#allocation5 + $0x30] sm:$0xff]   ;;  %s215_s22 = sshll.u32 %s362_s2, 4  ;;  %s216_s22 = int_to_ptr.vmem [resolvable:$true] %s215_s22 }
  0x3a   :  { %169 = vmatprep.subr.bf16.mxu0 %v361_v0  ;;  %v227_v6 = vcombine.high %v53_v5, %v53_v5  ;;  %v255_v10 = vld [vmem:[#allocation5 + $0x38] sm:$0xff]   ;;  %v256_v11 = vld [vmem:[#allocation5 + $0x40] sm:$0xff]   ;;  %v257_v12 = vld [vmem:[#allocation5 + $0x48] sm:$0xff]   ;;  %v226_v15 = vcombine.low %v53_v5, %v53_v5  ;;  %s328_s23 = scalar_lea.vmem %s216_s22, 128  ;;  %p333_p11 = scmp.lt.s32.totalorder %s216_s22, %s216_s22 }
  0x3b   :  { %v258_v13 = vld [vmem:[#allocation5 + $0x50] sm:$0xff]   ;;  %v259_v14 = vld [vmem:[#allocation5 + $0x58] sm:$0xff]   ;;  %v225_v16 = vld [vmem:[#allocation7] ss:$0 sm:$0xff]  ;;  %p329_p10 = scmp.ne.s32.totalorder %s216_s22, %s328_s23  ;;  %p334_p12 = scmp.lt.s32.totalorder %s328_s23, %s328_s23 }
  0x3c   :  { %240 = vmatprep.mubr.msk.bf16.mxu0 %vm163_vm0, %v227_v6 }
  0x3d   :  { %170 = vmatpush1.bf16.msra.mxu0 %v249_v2  ;;  %p335_p13 = por %p334_p12, %p333_p11 }
  0x3e   :  { %171 = vmatprep.subr.bf16.mxu0 %v361_v0 }
  0x3f   :  { %p336_p0 = pnand %p335_p13, %p329_p10 }
  0x41   :  { %172 = vmatpush1.bf16.msra.mxu0 %v250_v3 }
  0x42   :  { %173 = vmatprep.subr.bf16.mxu0 %v361_v0 }
  0x45   :  { %174 = vmatpush1.bf16.msra.mxu0 %v251_v4 }
  0x46   :  { %175 = vmatprep.subr.bf16.mxu0 %v361_v0 }
  0x49   :  { %176 = vmatpush1.bf16.msra.mxu0 %v252_v7 }
  0x4a   :  { %177 = vmatprep.subr.bf16.mxu0 %v361_v0 }
  0x4d   :  { %178 = vmatpush1.bf16.msra.mxu0 %v253_v8 }
  0x4e   :  { %179 = vmatprep.subr.bf16.mxu0 %v361_v0 }
  0x51   :  { %180 = vmatpush1.bf16.msra.mxu0 %v254_v9 }
  0x52   :  { %181 = vmatprep.subr.bf16.mxu0 %v361_v0 }
  0x55   :  { %182 = vmatpush1.bf16.msra.mxu0 %v255_v10 }
  0x56   :  { %183 = vmatprep.subr.bf16.mxu0 %v361_v0 }
  0x59   :  { %184 = vmatpush1.bf16.msra.mxu0 %v256_v11 }
  0x5a   :  { %185 = vmatprep.subr.bf16.mxu0 %v361_v0 }
  0x5d   :  { %186 = vmatpush1.bf16.msra.mxu0 %v257_v12 }
  0x5e   :  { %187 = vmatprep.subr.bf16.mxu0 %v361_v0 }
  0x61   :  { %188 = vmatpush1.bf16.msra.mxu0 %v258_v13 }
  0x62   :  { %189 = vmatprep.subr.bf16.mxu0 %v361_v0 }
  0x65   :  { %190 = vmatpush1.bf16.msra.mxu0 %v259_v14 }
  0x68   :  { %200 = vmatmul.mubr.bf16.vlgmr.msra.gmra.mrb[0].mxu0 %v226_v15 }
 0x13b   :  { %v201_v17 = vpop.f32.mrb[0].mxu0 }
 0x13c   :  { %v202_v18 = vadd.f32 %v225_v16, %v201_v17  ;;  %v203_v19 = vpop.f32.mrb[1].mxu0 }
 0x13d   :  { %v204_v20 = vpop.f32.mrb[2].mxu0 }
 0x13e   :  { %v205_v21 = vpop.f32.mrb[3].mxu0  ;;  %208 = vst.msk [vmem:[#allocation8] sm:$0xff] %vm207_vm1, %v202_v18 }
 0x13f   :  { %339 = shalt.err (!%p336_p0)
}
 0x140   :  { %s340_s26 = scalar_lea.hbm %s434_s3, 128 }
 0x141   :  { %p341_p1 = scmp.ne.s32.totalorder %s434_s3, %s340_s26  ;;  %p344_p2 = scmp.lt.u32.totalorder %s340_s26, %s434_s3 }
 0x143   :  { %p346_p3 = pnand %p344_p2, %p341_p1 }
 0x145   :  { %349 = shalt.err (!%p346_p3)
}
 0x146   :  { %218 = dma.vmem_to_hbm [thread:$0]  %s216_s22, 128, %s434_s3, [#allocation4]  }
 0x147   :  { %354 = dma.done.wait [#allocation4], 128  }
 0x148   :  { %355 = vsyncadd [#allocation4], 4294967168 }
 0x149   :  { %222 = vsyncpa [#allocation3], 1 }
 0x14a   :  { %223 = vsyncpa [#allocation6], 1 }
 0x14b   :  { %224 = vsyncpa [#allocation4], 1 }

// kernel: _lambda_.11
= control target key start
LH: loop header
LB: loop body
LE: loop exit
PB: predicated region body
PF: predicated region fallthrough
CT: control target
= control target key end

     0   :  { %10 = vsyncpa [#allocation3], 0  ;;  %s529_s0 = inlined_call_operand.hbm [shape: f32[10,32], index: 0, kind: input, shape index: {}]   ;;  %s530_s1 = inlined_call_operand.hbm [shape: f32[1,32], index: 1, kind: input, shape index: {}]   ;;  %s531_s2 = inlined_call_operand.hbm [shape: f32[1,32], index: 2, kind: input, shape index: {}]   ;;  %s532_s3 = inlined_call_operand.hbm [shape: bf16[32,96], index: 3, kind: input, shape index: {}]   ;;  %s533_s4 = inlined_call_operand.hbm [shape: f32[1,96], index: 4, kind: input, shape index: {}]   ;;  %s534_s5 = inlined_call_operand.hbm [shape: f32[10,96], index: 5, kind: output, shape index: {}]  }
   0x1   :  { %11 = vsyncpa [#allocation6], 0 }
   0x2   :  { %12 = vsyncpa [#allocation9], 0 }
   0x3   :  { %13 = vsyncpa [#allocation4], 0  ;;  %s399_s18 = smov [#allocation5]   ;;  %s400_s20 = smov [#allocation8]  }
   0x4   :  { %s32_s19 = sshll.u32 %s399_s18, 4  ;;  %s51_s21 = sshll.u32 %s400_s20, 4  ;;  %s33_s19 = int_to_ptr.vmem [resolvable:$true] %s32_s19  ;;  %s441_s21 = int_to_ptr.vmem [resolvable:$true] %s51_s21 }
   0x5   :  { %s259_s24 = scalar_lea.hbm %s530_s1, 16 }
   0x6   :  { %p260_p0 = scmp.ne.s32.totalorder %s530_s1, %s259_s24  ;;  %p263_p1 = scmp.lt.u32.totalorder %s259_s24, %s530_s1 }
   0x8   :  { %p265_p2 = pnand %p263_p1, %p260_p0 }
   0xa   :  { %268 = shalt.err (!%p265_p2)
}
   0xb   :  { %s269_s29 = scalar_lea.vmem %s33_s19, 16  ;;  %s273_s30 = scalar_lea.vmem %s33_s19, 32 }
   0xc   :  { %p270_p3 = scmp.ne.s32.totalorder %s33_s19, %s269_s29  ;;  %p274_p4 = scmp.lt.s32.totalorder %s33_s19, %s33_s19 }
   0xd   :  { %p275_p5 = scmp.lt.s32.totalorder %s273_s30, %s269_s29 }
   0xf   :  { %p276_p6 = por %p275_p5, %p274_p4 }
  0x11   :  { %p277_p7 = pnand %p276_p6, %p270_p3 }
  0x13   :  { %280 = shalt.err (!%p277_p7)
}
  0x14   :  { %35 = dma.hbm_to_vmem [thread:$0]  %s530_s1, 16, %s33_s19, [#allocation6]  }
  0x15   :  { %s281_s10 = scalar_lea.hbm %s532_s3, 256 }
  0x16   :  { %p282_p8 = scmp.ne.s32.totalorder %s532_s3, %s281_s10  ;;  %p285_p9 = scmp.lt.u32.totalorder %s281_s10, %s532_s3 }
  0x18   :  { %p287_p10 = pnand %p285_p9, %p282_p8 }
  0x1a   :  { %290 = shalt.err (!%p287_p10)
}
  0x1b   :  { %s291_s15 = scalar_lea.vmem %s441_s21, 256  ;;  %p296_p12 = scmp.lt.s32.totalorder %s441_s21, %s441_s21 }
  0x1c   :  { %p292_p11 = scmp.ne.s32.totalorder %s441_s21, %s291_s15  ;;  %p297_p13 = scmp.lt.s32.totalorder %s291_s15, %s291_s15 }
  0x1e   :  { %p298_p0 = por %p297_p13, %p296_p12 }
  0x20   :  { %p299_p1 = pnand %p298_p0, %p292_p11 }
  0x22   :  { %302 = shalt.err (!%p299_p1)
}
  0x23   :  { %s401_s1 = smov 64   ;;  %s402_s16 = smov 4  }
  0x24   :  { %57 = dma.hbm_to_vmem [thread:$0]  %s532_s3, 256, %s441_s21, [#allocation9], %s401_s1, %s401_s1, %s402_s16  }
  0x25   :  { %s403_s19 = smov [#allocation2]   ;;  %s303_s24 = scalar_lea.hbm %s529_s0, 256 }
  0x26   :  { %s19_s20 = sshll.u32 %s403_s19, 4  ;;  %p304_p2 = scmp.ne.s32.totalorder %s529_s0, %s303_s24  ;;  %s20_s20 = int_to_ptr.vmem [resolvable:$true] %s19_s20 }
  0x27   :  { %p307_p3 = scmp.lt.u32.totalorder %s303_s24, %s529_s0 }
  0x29   :  { %p309_p4 = pnand %p307_p3, %p304_p2 }
  0x2b   :  { %312 = shalt.err (!%p309_p4)
}
  0x2c   :  { %s313_s29 = scalar_lea.vmem %s20_s20, 256  ;;  %p318_p6 = scmp.lt.s32.totalorder %s20_s20, %s20_s20 }
  0x2d   :  { %p314_p5 = scmp.ne.s32.totalorder %s20_s20, %s313_s29  ;;  %p319_p7 = scmp.lt.s32.totalorder %s313_s29, %s313_s29 }
  0x2f   :  { %p320_p8 = por %p319_p7, %p318_p6 }
  0x31   :  { %p321_p9 = pnand %p320_p8, %p314_p5 }
  0x33   :  { %324 = shalt.err (!%p321_p9)
}
  0x34   :  { %s404_s3 = smov 128   ;;  %s405_s21 = smov 8  }
  0x35   :  { %25 = dma.hbm_to_vmem [thread:$0]  %s529_s0, 256, %s20_s20, [#allocation3], %s404_s3, %s404_s3, %s405_s21  }
  0x36   :  { %s406_s7 = smov [#allocation7]   ;;  %s407_s9 = smov [#allocation10]  }
  0x37   :  { %s42_s8 = sshll.u32 %s406_s7, 4  ;;  %s64_s10 = sshll.u32 %s407_s9, 4  ;;  %s43_s8 = int_to_ptr.vmem [resolvable:$true] %s42_s8  ;;  %s65_s10 = int_to_ptr.vmem [resolvable:$true] %s64_s10 }
  0x38   :  { %s325_s13 = scalar_lea.hbm %s531_s2, 16 }
  0x39   :  { %p326_p10 = scmp.ne.s32.totalorder %s531_s2, %s325_s13  ;;  %p329_p11 = scmp.lt.u32.totalorder %s325_s13, %s531_s2 }
  0x3b   :  { %p331_p12 = pnand %p329_p11, %p326_p10 }
  0x3d   :  { %334 = shalt.err (!%p331_p12)
}
  0x3e   :  { %s335_s0 = scalar_lea.vmem %s43_s8, 16  ;;  %s339_s17 = scalar_lea.vmem %s43_s8, 32 }
  0x3f   :  { %p336_p13 = scmp.ne.s32.totalorder %s43_s8, %s335_s0  ;;  %p340_p0 = scmp.lt.s32.totalorder %s43_s8, %s43_s8 }
  0x40   :  { %p341_p1 = scmp.lt.s32.totalorder %s339_s17, %s335_s0 }
  0x42   :  { %p342_p2 = por %p341_p1, %p340_p0 }
  0x44   :  { %p343_p3 = pnand %p342_p2, %p336_p13 }
  0x46   :  { %346 = shalt.err (!%p343_p3)
}
  0x47   :  { %45 = dma.hbm_to_vmem [thread:$0]  %s531_s2, 16, %s43_s8, [#allocation6]  }
  0x48   :  { %s347_s23 = scalar_lea.hbm %s533_s4, 16 }
  0x49   :  { %p348_p4 = scmp.ne.s32.totalorder %s533_s4, %s347_s23  ;;  %p351_p5 = scmp.lt.u32.totalorder %s347_s23, %s533_s4 }
  0x4b   :  { %p353_p6 = pnand %p351_p5, %p348_p4 }
  0x4d   :  { %356 = shalt.err (!%p353_p6)
}
  0x4e   :  { %s357_s28 = scalar_lea.vmem %s65_s10, 16  ;;  %s361_s29 = scalar_lea.vmem %s65_s10, 32 }
  0x4f   :  { %p358_p7 = scmp.ne.s32.totalorder %s65_s10, %s357_s28  ;;  %p362_p8 = scmp.lt.s32.totalorder %s65_s10, %s65_s10 }
  0x50   :  { %p363_p9 = scmp.lt.s32.totalorder %s361_s29, %s357_s28 }
  0x52   :  { %p364_p10 = por %p363_p9, %p362_p8 }
  0x54   :  { %p365_p11 = pnand %p364_p10, %p358_p7 }
  0x56   :  { %368 = shalt.err (!%p365_p11)
}
  0x57   :  { %67 = dma.hbm_to_vmem [thread:$0]  %s533_s4, 16, %s65_s10, [#allocation9]  }
  0x58   :  { %391 = dma.done.wait [#allocation3], 256  }
  0x59   :  { %392 = vsyncadd [#allocation3], 4294967040 }
  0x5a   :  { %393 = dma.done.wait [#allocation6], 32  }
  0x5b   :  { %394 = vsyncadd [#allocation6], 4294967264 }
  0x5c   :  { %395 = dma.done.wait [#allocation9], 272  }
  0x5d   :  { %396 = vsyncadd [#allocation9], 4294967024  ;;  %vm88_vm0 = vcmask 261120   ;;  %v84_v0 = vld [vmem:[#allocation2] sm:$0xff]  ;;  %v85_v1 = vld [vmem:[#allocation2 + $0x8] sm:$0x3] }
  0x5e   :  { %vm92_vm1 = vcmask 254976   ;;  %v89_v2 = vsel %vm88_vm0, %v84_v0, 0.0  ;;  %v253_v14 = vld [vmem:[#allocation8] sm:$0xff]   ;;  %v408_v15 = vmov 0.0   ;;  %v254_v16 = vld [vmem:[#allocation8 + $0x8] sm:$0xff]   ;;  %vm409_vm2 = vmmov 0  }
  0x5f   :  { %90 = vadd.xlane.f32.xlu0 %v89_v2  ;;  %v93_v3 = vsel %vm92_vm1, %v85_v1, 0.0  ;;  %233 = vmatprep.subr.bf16.mxu0 %v408_v15  ;;  %v224_v25 = vld [vmem:[#allocation5] ss:$0 sm:$0xff]  ;;  %v225_v29 = vld [vmem:[#allocation7] ss:$0 sm:$0xff]  ;;  %vm201_vm3 = vcmask 785408  }
  0x60   :  { %234 = vmatpush3.bf16.msra.mxu0 %v253_v14  ;;  %237 = vmatprep.mubr.msk.bf16.mxu0 %vm409_vm2, %v408_v15  ;;  %v226_v34 = vld [vmem:[#allocation10] ss:$0 sm:$0xff]  ;;  %s410_s4 = smov [#allocation11]   ;;  %vm203_vm4 = vcmask 779264  }
  0x61   :  { %235 = vmatprep.subr.bf16.mxu0 %v408_v15  ;;  %s210_s6 = sshll.u32 %s410_s4, 4  ;;  %s211_s6 = int_to_ptr.vmem [resolvable:$true] %s210_s6 }
  0x62   :  { %s369_s7 = scalar_lea.vmem %s211_s6, 256  ;;  %p374_p13 = scmp.lt.s32.totalorder %s211_s6, %s211_s6 }
  0x63   :  { %94 = vadd.xlane.f32.xlu0 %v93_v3  ;;  %p370_p12 = scmp.ne.s32.totalorder %s211_s6, %s369_s7  ;;  %p375_p0 = scmp.lt.s32.totalorder %s369_s7, %s369_s7 }
  0x64   :  { %236 = vmatpush3.bf16.msra.mxu0 %v254_v16 }
  0x65   :  { %p376_p1 = por %p375_p0, %p374_p13 }
  0x67   :  { %p377_p2 = pnand %p376_p1, %p370_p12 }
  0xec   :  { %v91_v4 = vpop.xlane.xlu0 %90 }
  0xed   :  { %v97_v5 = vmul.f32 0.03125, %v91_v4 }
  0xef   :  { %v99_v6 = vsub.f32 %v84_v0, %v97_v5 }
  0xf0   :  { %v95_v7 = vpop.xlane.xlu0 %94 }
  0xf1   :  { %v98_v8 = vmul.f32 0.03125, %v95_v7  ;;  %v101_v9 = vmul.f32 %v99_v6, %v99_v6 }
  0xf3   :  { %v100_v10 = vsub.f32 %v85_v1, %v98_v8  ;;  %v103_v11 = vsel %vm88_vm0, %v101_v9, 0.0 }
  0xf4   :  { %104 = vadd.xlane.f32.xlu1 %v103_v11 }
  0xf5   :  { %v102_v12 = vmul.f32 %v100_v10, %v100_v10 }
  0xf7   :  { %v106_v13 = vsel %vm92_vm1, %v102_v12, 0.0 }
  0xf8   :  { %107 = vadd.xlane.f32.xlu1 %v106_v13 }
 0x181   :  { %v105_v17 = vpop.xlane.xlu1 %104 }
 0x182   :  { %v109_v18 = vmul.f32 0.03125, %v105_v17 }
 0x184   :  { %v111_v19 = vadd.f32 1e-06, %v109_v18 }
 0x185   :  { %v108_v20 = vpop.xlane.xlu1 %107 }
 0x186   :  { %255 = vrsqrt.f32 %v111_v19  ;;  %v110_v21 = vmul.f32 0.03125, %v108_v20 }
 0x188   :  { %v112_v22 = vadd.f32 1e-06, %v110_v21 }
 0x18a   :  { %257 = vrsqrt.f32 %v112_v22 }
 0x190   :  { %v256_v23 = vpop.eup %255 }
 0x191   :  { %v115_v24 = vmul.f32 %v256_v23, %v99_v6 }
 0x193   :  { %v123_v28 = vmul.f32 %v224_v25, %v115_v24 }
 0x194   :  { %v258_v26 = vpop.eup %257 }
 0x195   :  { %v116_v27 = vmul.f32 %v258_v26, %v100_v10  ;;  %v131_v31 = vadd.f32 %v225_v29, %v123_v28 }
 0x197   :  { %v124_v30 = vmul.f32 %v224_v25, %v116_v27 }
 0x199   :  { %v132_v32 = vadd.f32 %v225_v29, %v124_v30 }
 0x19b   :  { %v133_v33 = vpack.c.bf16 %v132_v32, %v131_v31 }
 0x19d   :  { %238 = vmatmul.mubr.msk.bf16.vlgmr.msra.gmra.mrb[0].mxu0 %vm88_vm0, %v133_v33 }
 0x270   :  { %v194_v35 = vpop.f32.mrb[0].mxu0 }
 0x271   :  { %v195_v36 = vadd.f32 %v226_v34, %v194_v35  ;;  %v239_v37 = vpop.f32.mrb[1].mxu0 }
 0x272   :  { %v197_v38 = vpop.f32.mrb[2].mxu0 }
 0x273   :  { %v198_v39 = vadd.f32 %v226_v34, %v197_v38  ;;  %v240_v40 = vpop.f32.mrb[3].mxu0  ;;  %202 = vst.msk [vmem:[#allocation11] sm:$0xff] %vm201_vm3, %v195_v36 }
 0x275   :  { %204 = vst.msk [vmem:[#allocation11 + $0x8] sm:$0x3] %vm203_vm4, %v198_v39 }
 0x276   :  { %380 = shalt.err (!%p377_p2)
}
 0x277   :  { %s381_s10 = scalar_lea.hbm %s534_s5, 256 }
 0x278   :  { %p382_p3 = scmp.ne.s32.totalorder %s534_s5, %s381_s10  ;;  %p385_p4 = scmp.lt.u32.totalorder %s381_s10, %s534_s5 }
 0x27a   :  { %p387_p5 = pnand %p385_p4, %p382_p3 }
 0x27c   :  { %390 = shalt.err (!%p387_p5)
}
 0x27d   :  { %216 = dma.vmem_to_hbm [thread:$0]  %s211_s6, 256, %s534_s5, [#allocation4], %s404_s3, %s404_s3, %s405_s21  }
 0x27e   :  { %397 = dma.done.wait [#allocation4], 256  }
 0x27f   :  { %398 = vsyncadd [#allocation4], 4294967040 }
 0x280   :  { %220 = vsyncpa [#allocation3], 1 }
 0x281   :  { %221 = vsyncpa [#allocation6], 1 }
 0x282   :  { %222 = vsyncpa [#allocation9], 1 }
 0x283   :  { %223 = vsyncpa [#allocation4], 1 }

// kernel: _lambda_.12
= control target key start
LH: loop header
LB: loop body
LE: loop exit
PB: predicated region body
PF: predicated region fallthrough
CT: control target
= control target key end

     0   :  { %6 = vsyncpa [#allocation3], 0  ;;  %s1213_s0 = inlined_call_operand.hbm [shape: f32[2,5,96], index: 0, kind: input, shape index: {}]   ;;  %s1214_s1 = inlined_call_operand.hbm [shape: bf16[2,5,32], index: 1, kind: output, shape index: {}]  }
   0x1   :  { %8 = vsyncpa [#allocation3 + $0x1], 0 }
   0x2   :  { %9 = vsyncpa [#allocation4], 0 }
   0x3   :  { %11 = vsyncpa [#allocation4 + $0x1], 0  ;;  %s983_s6 = smov 0   ;;  %s985_s7 = smov 0  }
   0x4   :  { %s987_s8 = smov 0   ;;  %s989_s9 = smov 0  }
   0x5 LB: > { %s1004_s10 = sadd.s32 4294967295, %s952_s9   ;;  %s693_s11 = sadd.s32 4294967294, %s952_s9   ;;  %s952_s9 = sphi %s989_s9, %s1229_s9   ;;  %s948_s8 = sphi %s987_s8, %s1228_s8   ;;  %s944_s7 = sphi %s985_s7, %s1227_s7   ;;  %s940_s6 = sphi %s983_s6, %s1226_s6  }
   0x6   : > { %s1008_s12 = sadd.s32 1, %s952_s9   ;;  %s24_s13 = sadd.s32 1, %s948_s8 }
   0x7   : > { %s21_s14 = ssub.s32 %s952_s9, %s1008_s12  ;;  %p31_p0 = scmp.ne.s32.totalorder %s948_s8, %s944_s7 }
   0x8   : > { %p22_p1 = scmp.eq.s32.totalorder %s21_s14, 0  ;;  %p32_p2 = scmp.eq.s32.totalorder %s952_s9, 0 }
   0x9   : > { %p37_p3 = scmp.ne.s32.totalorder %s944_s7, %s940_s6  ;;  %p38_p4 = scmp.eq.s32.totalorder %s1004_s10, 0 }
   0xa   : > { %s1020_s15 = scalar_select %p22_p1, %s948_s8, %s24_s13  }
   0xb   : > { %p1022_p5 = por %p32_p2, %p31_p0  ;;  %p1026_p6 = por %p38_p4, %p37_p3 }
   0xc   : > { %p61_p7 = scmp.eq.s32.totalorder %s1004_s10, 1  ;;  %p67_p8 = scmp.eq.s32.totalorder %s693_s11, 1 }
   0xd   : > { %p789_p10 = scmp.lt.s32.totalorder %s952_s9, 2  ;;  %s87_s20 = sand.u32 1, %s948_s8  }
   0xe   : > { %p1033_p11 = por %p61_p7, %p31_p0  ;;  %p1037_p12 = por %p67_p8, %p37_p3 }
   0xf   : > { %s697_s21 = sshll.u32 %s952_s9, 7  ;;  %s696_s22 = sshll.u32 %s87_s20, 3 }
  0x10   : > { %s1218_s18 = scalar_select %p1033_p11, 1, 0 }
  0x11   : > { %s1219_s19 = scalar_select %p1037_p12, 1, 0 }
  0x12   : > { %s1046_s25 = scalar_lea.hbm %s1213_s0, %s697_s21  ;;  %s91_s26 = scalar_lea.vmem [#allocation2], %s696_s22 }
  0x13   : > { %s98_s27 = sshll.u32 %s91_s26, 4  ;;  %p1050_p13 = pnand %p789_p10, %p1022_p5  ;;  %s1054_s27 = int_to_ptr.vmem [resolvable:$true] %s98_s27 }
  0x14   : > { %s88_s29 = scalar_lea.sflag [#allocation3], %s87_s20  ;;  %s856_s30 = scalar_lea.hbm %s1046_s25, 128 }
  0x15   : > { %p857_p2 = scmp.ne.s32.totalorder %s1046_s25, %s856_s30  ;;  %p858_p3 = pneg %p1050_p13 }
  0x16   : > { %s861_s4 = scalar_lea.hbm %s1213_s0, 256  ;;  %p862_p5 = scmp.lt.u32.totalorder %s1046_s25, %s1213_s0 }
  0x17   : > { %p859_p4 = pnand %p858_p3, %p857_p2  ;;  %p863_p8 = scmp.lt.u32.totalorder %s861_s4, %s856_s30 }
  0x18   : > { %p865_p9 = scmp.lt.u32.totalorder %s856_s30, %s1046_s25 }
  0x19   : > { %p860_p7 = pneg %p859_p4  ;;  %p864_p10 = por %p863_p8, %p862_p5 }
  0x1b   : > { %p866_p0 = por %p865_p9, %p864_p10 }
  0x1d   : > { %p867_p1 = pnand %p866_p0, %p860_p7 }
  0x1f   : > { %870 = shalt.err (!%p867_p1)
}
  0x20   : > { %s871_s13 = scalar_lea.vmem %s1054_s27, 128  ;;  %s954_s14 = smov [#allocation2]  }
  0x21   : > { %p872_p2 = scmp.ne.s32.totalorder %s1054_s27, %s871_s13  ;;  %s876_s16 = sshll.u32 %s954_s14, 4  ;;  %s877_s16 = int_to_ptr.vmem [resolvable:$false] %s876_s16 }
  0x22   : > { %s878_s20 = scalar_lea.vmem %s877_s16, 256  ;;  %p879_p11 = scmp.lt.s32.totalorder %s1054_s27, %s877_s16 }
  0x23   : > { %p874_p4 = pnand %p872_p2, %p858_p3  ;;  %p880_p5 = scmp.lt.s32.totalorder %s878_s20, %s871_s13 }
  0x25   : > { %p875_p12 = pneg %p874_p4  ;;  %p881_p8 = por %p880_p5, %p879_p11 }
  0x27   : > { %p882_p9 = pnand %p881_p8, %p875_p12 }
  0x29   : > { %885 = shalt.err (!%p882_p9)
}
  0x2a   : > { %784 = dma.hbm_to_vmem [thread:$0]  (!%p1050_p13), %s1046_s25, 128, %s1054_s27, %s88_s29  }
  0x2b   : > { %p1221_p0 = scmp.lt.s32.totalorder %s952_s9, 3  ;;  %p1222_p1 = scmp.ge.s32.totalorder %s952_s9, 1 }
  0x2d   : > { %p104_p3 = pnand %p1222_p1, %p1221_p0 }
  0x2e   : > { %s1088_s21 = sand.u32 (!%p104_p3), 1, %s944_s7  }
  0x2f   : > { %107 = sbr.rel (%p104_p3) target bundleno = 1612 (0x64c), region = 24  ;;  %s699_s22 = sshll.u32 (!%p104_p3), %s1088_s21, 3 }
  0x30   : > { %s110_s23 = scalar_lea.sflag (!%p104_p3), [#allocation3], %s1088_s21  ;;  %s113_s24 = scalar_lea.vmem (!%p104_p3), [#allocation2], %s699_s22 }
  0x36   : > { %931 = dma.done.wait (%p1026_p6), %s110_s23, 128  }
  0x37   : > { %933 = vsyncadd (%p1026_p6), %s110_s23, 4294967168  ;;  %v955_v0 = vmov 0.0   ;;  %vm956_vm0 = vmmov 0   ;;  %v133_v1 = vld [vmem:[%s113_s24] sm:$0x1f]  ;;  %s957_s25 = smov 96  }
  0x38   : > { %729 = vmatprep.subr.bf16.mxu0 %v955_v0  ;;  %731 = vmatprep.mubr.msk.bf16.mxu0 %vm956_vm0, %v955_v0  ;;  %v1102_v2 = vpack.c.bf16 %v133_v1, %v133_v1  ;;  %vm138_vm1 = vcmask 64512   ;;  %s958_s17 = smov 64   ;;  %s959_s26 = smov 88   ;;  %vm186_vm2 = vcmask 36864   ;;  %vm205_vm3 = vcmask 1041408  }
  0x39   : > { %735 = vmatprep.subr.bf16.mxu1 %v955_v0  ;;  %737 = vmatprep.mubr.msk.bf16.mxu1 %vm956_vm0, %v955_v0  ;;  %s960_s27 = smov 72   ;;  %vm206_vm4 = vcmask 1042432   ;;  %v961_v12 = vmov 65535   ;;  %s962_s28 = smov 120   ;;  %vm201_vm5 = vcmask 39936   ;;  %vm598_vm6 = vcmask 130048  }
  0x3a   : > { %136 = vrot.lane.b32.xlu0 %v1102_v2, %s957_s25  ;;  %199 = vrot.lane.b32.xlu1 %v1102_v2, %s958_s17  ;;  %v207_v13 = vsel %vm205_vm3, 4294967295, %v961_v12  ;;  %s963_s29 = smov 80   ;;  %s964_s30 = smov 112   ;;  %vm600_vm7 = vcmask 195584   ;;  %vm603_vm8 = vcmask 256000  }
  0x3b   : > { %v1115_v14 = vsel %vm206_vm4, %v207_v13, 0  ;;  %s965_s2 = smov 104   ;;  %s966_s3 = smov 56   ;;  %vm604_vm9 = vsmask.f32 2304 }
  0x3c   : > { %s967_s4 = smov 40   ;;  %s968_s5 = smov 48   ;;  %vm605_vm10 = vmand %vm603_vm8, %vm604_vm9 }
  0x3d   : > { %s969_s11 = smov 8   ;;  %s970_s13 = smov 16  }
  0x3e   : > { %254 = vrot.lane.b32.xlu1 %v1102_v2, %s959_s26  ;;  %s971_s14 = smov 24   ;;  %s700_s16 = sshll.u32 %s1088_s21, 2 }
  0x3f   : > { %s710_s20 = sshll.u32 %s1004_s10, 6  ;;  %s131_s22 = scalar_lea.vmem [#allocation5], %s700_s16 }
  0x40   : > { %s623_s23 = sshll.u32 %s131_s22, 4  ;;  %s1169_s17 = scalar_lea.hbm %s1214_s1, %s710_s20  ;;  %s1171_s23 = int_to_ptr.vmem [resolvable:$true] %s623_s23 }
  0x41   : > { %s610_s26 = scalar_lea.sflag [#allocation4], %s1088_s21  ;;  %s886_s10 = scalar_lea.vmem %s1171_s23, 64 }
  0x42   : > { %p887_p6 = scmp.ne.s32.totalorder %s1171_s23, %s886_s10  ;;  %p1223_p11 = scmp.ne.s32.totalorder %s1218_s18, 0 }
  0x44   : > { %p888_p12 = pnand %p887_p6, %p1223_p11 }
  0x46   : > { %p889_p13 = pneg %p888_p12 }
  0xac   : > { %v137_v3 = vpop.permute.xlu0 %136  ;;  %v200_v11 = vpop.permute.xlu1 %199 }
  0xad   : > { %v143_v4 = vsel %vm138_vm1, %v137_v3, 0  ;;  %v210_v15 = vand.u32 %v1115_v14, %v200_v11 }
  0xae   : > { %730 = vmatpush3.bf16.xpose.msra.mxu0 %v143_v4 }
  0xaf   : > { %747 = vmatprep.subr.bf16.mxu0 %v955_v0  ;;  %736 = vmatpush3.bf16.msra.mxu1 %v210_v15 }
  0xb0   : > { %741 = vmatprep.subr.bf16.mxu1 %v955_v0  ;;  %v255_v21 = vpop.permute.xlu1 %254 }
  0xb1   : > { %v260_v27 = vsel %vm138_vm1, %v255_v21, 0 }
  0xb5   : > { %732 = vmatmul.mubr.msk.bf16.vlgmr.msra.gmra.mrb[0].mxu0 %vm138_vm1, %v1102_v2 }
  0xb6   : > { %749 = vmatprep.mubr.msk.bf16.mxu0 %vm956_vm0, %v955_v0 }
 0x188   : > { %v179_v5 = vpop.f32.mrb[0].mxu0 }
 0x189   : > { %v185_v6 = vmul.f32 0.35355338, %v179_v5  ;;  %v733_v7 = vpop.f32.mrb[1].mxu0 }
 0x18a   : > { %v182_v8 = vpop.f32.mrb[2].mxu0 }
 0x18b   : > { %v734_v9 = vpop.f32.mrb[3].mxu0  ;;  %v187_v10 = vsel %vm186_vm2, %v185_v6, -inf }
 0x18c   : > { %188 = vmax.xlane.f32.xlu0 %v187_v10 }
 0x1a2   : > { %476 = vrot.lane.b32.xlu0 %v1102_v2, %s960_s27  ;;  %s972_s27 = smov [#allocation5]  }
 0x219   : > { %v189_v16 = vpop.xlane.xlu0 %188 }
 0x21a   : > { %v190_v17 = vsub.f32 %v185_v6, %v189_v16 }
 0x21c   : > { %v191_v18 = vmul.f32 1.442695, %v190_v17 }
 0x21d   : > { %v477_v30 = vpop.permute.xlu0 %476 }
 0x21e   : > { %840 = vpow2.f32 %v191_v18  ;;  %v482_v32 = vsel %vm138_vm1, %v477_v30, 0 }
 0x228   : > { %v841_v19 = vpop.eup %840 }
 0x229   : > { %v193_v20 = vsel %vm186_vm2, %v841_v19, 0.0 }
 0x22a   : > { %194 = vadd.xlane.f32.xlu1 %v193_v20 }
 0x23b   : > { %252 = vrot.lane.b32.xlu1 %v1102_v2, %s962_s28  ;;  %s890_s28 = sshll.u32 %s972_s27, 4  ;;  %s891_s28 = int_to_ptr.vmem [resolvable:$false] %s890_s28 }
 0x23c   : > { %p893_p7 = scmp.lt.s32.totalorder %s1171_s23, %s891_s28 }
 0x23f   : > { %365 = vrot.lane.b32.xlu1 %v1102_v2, %s963_s29  ;;  %s892_s29 = scalar_lea.vmem %s891_s28, 128 }
 0x240   : > { %p894_p10 = scmp.lt.s32.totalorder %s892_s29, %s886_s10 }
 0x242   : > { %p895_p2 = por %p894_p10, %p893_p7 }
 0x243   : > { %363 = vrot.lane.b32.xlu1 %v1102_v2, %s964_s30 }
 0x244   : > { %p896_p4 = pnand %p895_p2, %p889_p13 }
 0x247   : > { %474 = vrot.lane.b32.xlu1 %v1102_v2, %s965_s2 }
 0x2b7   : > { %v195_v22 = vpop.xlane.xlu1 %194 }
 0x2b8   : > { %842 = vrcp.f32 %v195_v22 }
 0x2bb   : > { %v253_v25 = vpop.permute.xlu1 %252 }
 0x2bf   : > { %v366_v28 = vpop.permute.xlu1 %365 }
 0x2c0   : > { %v371_v29 = vsel %vm138_vm1, %v366_v28, 0 }
 0x2c2   : > { %v843_v23 = vpop.eup %842 }
 0x2c3   : > { %v197_v24 = vmul.f32 %v843_v23, %v841_v19  ;;  %v364_v31 = vpop.permute.xlu1 %363 }
 0x2c5   : > { %v198_v26 = vpack.c.bf16 %v197_v24, %v197_v24 }
 0x2c7   : > { %738 = vmatmul.mubr.msk.bf16.vlgmr.msra.gmra.mrb[0].mxu1 %vm201_vm5, %v198_v26  ;;  %v475_v33 = vpop.permute.xlu1 %474 }
 0x2c8   : > { %742 = vmatpush3.bf16.xpose.msra.mxu1 %v260_v27  ;;  %743 = vmatprep.mubr.msk.bf16.mxu1 %vm956_vm0, %v955_v0 }
 0x2c9   : > { %753 = vmatprep.subr.bf16.mxu1 %v955_v0 }
 0x2cf   : > { %744 = vmatmul.mubr.msk.bf16.vlgmr.msra.gmra.mrb[4].mxu1 %vm138_vm1, %v253_v25 }
 0x2d0   : > { %754 = vmatpush3.bf16.xpose.msra.mxu1 %v371_v29  ;;  %755 = vmatprep.mubr.msk.bf16.mxu1 %vm956_vm0, %v955_v0 }
 0x2d1   : > { %765 = vmatprep.subr.bf16.mxu1 %v955_v0 }
 0x2d7   : > { %756 = vmatmul.mubr.msk.bf16.vlgmr.msra.gmra.mrb[8].mxu1 %vm138_vm1, %v364_v31 }
 0x2d8   : > { %766 = vmatpush3.bf16.xpose.msra.mxu1 %v482_v32  ;;  %767 = vmatprep.mubr.msk.bf16.mxu1 %vm956_vm0, %v955_v0 }
 0x2df   : > { %768 = vmatmul.mubr.msk.bf16.vlgmr.msra.gmra.mrb[12].mxu1 %vm138_vm1, %v475_v33 }
 0x39a   : > { %v1139_v34 = vpop.f32.mrb[0].mxu1 }
 0x39b   : > { %v739_v35 = vpop.f32.mrb[1].mxu1 }
 0x39c   : > { %v249_v36 = vpop.f32.mrb[2].mxu1 }
 0x39d   : > { %v740_v37 = vpop.f32.mrb[3].mxu1 }
 0x3a2   : > { %v296_v38 = vpop.f32.mrb[4].mxu1 }
 0x3a3   : > { %v302_v39 = vmul.f32 0.35355338, %v296_v38  ;;  %v745_v40 = vpop.f32.mrb[5].mxu1 }
 0x3a4   : > { %v299_v41 = vpop.f32.mrb[6].mxu1 }
 0x3a5   : > { %v746_v42 = vpop.f32.mrb[7].mxu1  ;;  %v303_v43 = vsel %vm186_vm2, %v302_v39, -inf }
 0x3a6   : > { %304 = vmax.xlane.f32.xlu1 %v303_v43  ;;  %v606_v43 = vld [vmem:[%s131_s22] sm:$0x7] }
 0x3aa   : > { %v407_v44 = vpop.f32.mrb[8].mxu1 }
 0x3ab   : > { %v413_v45 = vmul.f32 0.35355338, %v407_v44  ;;  %v757_v46 = vpop.f32.mrb[9].mxu1 }
 0x3ac   : > { %v410_v47 = vpop.f32.mrb[10].mxu1 }
 0x3ad   : > { %v758_v48 = vpop.f32.mrb[11].mxu1  ;;  %v414_v49 = vsel %vm186_vm2, %v413_v45, -inf }
 0x3ae   : > { %415 = vmax.xlane.f32.xlu0 %v414_v49 }
 0x3b2   : > { %v518_v50 = vpop.f32.mrb[12].mxu1 }
 0x3b3   : > { %v524_v51 = vmul.f32 0.35355338, %v518_v50  ;;  %v769_v52 = vpop.f32.mrb[13].mxu1 }
 0x3b4   : > { %v521_v53 = vpop.f32.mrb[14].mxu1 }
 0x3b5   : > { %v770_v54 = vpop.f32.mrb[15].mxu1  ;;  %v525_v55 = vsel %vm186_vm2, %v524_v51, -inf }
 0x3b6   : > { %526 = vmax.xlane.f32.xlu1 %v525_v55 }
 0x3c7   : > { %315 = vrot.lane.b32.xlu1 %v1102_v2, %s966_s3 }
 0x433   : > { %v305_v56 = vpop.xlane.xlu1 %304 }
 0x434   : > { %v306_v57 = vsub.f32 %v302_v39, %v305_v56 }
 0x436   : > { %v307_v58 = vmul.f32 1.442695, %v306_v57 }
 0x438   : > { %844 = vpow2.f32 %v307_v58 }
 0x43b   : > { %v416_v59 = vpop.xlane.xlu0 %415 }
 0x43c   : > { %v417_v60 = vsub.f32 %v413_v45, %v416_v59 }
 0x43e   : > { %v418_v61 = vmul.f32 1.442695, %v417_v60 }
 0x440   : > { %846 = vpow2.f32 %v418_v61 }
 0x442   : > { %v845_v62 = vpop.eup %844 }
 0x443   : > { %v527_v63 = vpop.xlane.xlu1 %526  ;;  %v309_v1 = vsel %vm186_vm2, %v845_v62, 0.0 }
 0x444   : > { %v528_v3 = vsub.f32 %v524_v51, %v527_v63  ;;  %310 = vadd.xlane.f32.xlu1 %v309_v1 }
 0x446   : > { %v529_v4 = vmul.f32 1.442695, %v528_v3 }
 0x447   : > { %v316_v5 = vpop.permute.xlu1 %315 }
 0x448   : > { %848 = vpow2.f32 %v529_v4  ;;  %v321_v6 = vand.u32 %v316_v5, %v1115_v14 }
 0x44a   : > { %v847_v7 = vpop.eup %846  ;;  %748 = vmatpush3.bf16.msra.mxu0 %v321_v6 }
 0x44b   : > { %v420_v8 = vsel %vm186_vm2, %v847_v7, 0.0  ;;  %759 = vmatprep.subr.bf16.mxu0 %v955_v0 }
 0x44c   : > { %421 = vadd.xlane.f32.xlu1 %v420_v8 }
 0x452   : > { %v849_v9 = vpop.eup %848 }
 0x453   : > { %v531_v10 = vsel %vm186_vm2, %v849_v9, 0.0 }
 0x454   : > { %532 = vadd.xlane.f32.xlu0 %v531_v10 }
 0x45d   : > { %537 = vrot.lane.b32.xlu1 %v1102_v2, %s967_s4 }
 0x46a   : > { %426 = vrot.lane.b32.xlu0 %v1102_v2, %s968_s5 }
 0x4d1   : > { %v311_v11 = vpop.xlane.xlu1 %310 }
 0x4d2   : > { %850 = vrcp.f32 %v311_v11 }
 0x4d9   : > { %v422_v12 = vpop.xlane.xlu1 %421 }
 0x4da   : > { %852 = vrcp.f32 %v422_v12 }
 0x4dc   : > { %v851_v13 = vpop.eup %850 }
 0x4dd   : > { %v313_v15 = vmul.f32 %v851_v13, %v845_v62  ;;  %v538_v21 = vpop.permute.xlu1 %537 }
 0x4de   : > { %v543_v22 = vand.u32 %v538_v21, %v1115_v14 }
 0x4df   : > { %v314_v16 = vpack.c.bf16 %v313_v15, %v313_v15 }
 0x4e1   : > { %750 = vmatmul.mubr.msk.bf16.vlgmr.msra.gmra.mrb[4].mxu0 %vm201_vm5, %v314_v16  ;;  %v533_v17 = vpop.xlane.xlu0 %532 }
 0x4e2   : > { %854 = vrcp.f32 %v533_v17  ;;  %761 = vmatprep.mubr.msk.bf16.mxu0 %vm956_vm0, %v955_v0 }
 0x4e4   : > { %v853_v18 = vpop.eup %852 }
 0x4e5   : > { %v424_v19 = vmul.f32 %v853_v18, %v847_v7  ;;  %v427_v20 = vpop.permute.xlu0 %426 }
 0x4e6   : > { %v432_v2 = vand.u32 %v427_v20, %v1115_v14 }
 0x4e7   : > { %v425_v23 = vpack.c.bf16 %v424_v19, %v424_v19 }
 0x4e8   : > { %760 = vmatpush3.bf16.msra.mxu0 %v432_v2 }
 0x4e9   : > { %771 = vmatprep.subr.bf16.mxu0 %v955_v0 }
 0x4eb   : > { %762 = vmatmul.mubr.msk.bf16.vlgmr.msra.gmra.mrb[8].mxu0 %vm201_vm5, %v425_v23 }
 0x4ec   : > { %v855_v24 = vpop.eup %854  ;;  %772 = vmatpush3.bf16.msra.mxu0 %v543_v22  ;;  %773 = vmatprep.mubr.msk.bf16.mxu0 %vm956_vm0, %v955_v0 }
 0x4ed   : > { %v535_v25 = vmul.f32 %v855_v24, %v849_v9 }
 0x4ef   : > { %v536_v26 = vpack.c.bf16 %v535_v25, %v535_v25 }
 0x4f3   : > { %774 = vmatmul.mubr.msk.bf16.vlgmr.msra.gmra.mrb[12].mxu0 %vm201_vm5, %v536_v26 }
 0x5b4   : > { %v357_v27 = vpop.f32.mrb[4].mxu0 }
 0x5b5   : > { %586 = vrot.lane.b32.xlu1 %v357_v27, %s969_s11  ;;  %v751_v28 = vpop.f32.mrb[5].mxu0 }
 0x5b6   : > { %v360_v14 = vpop.f32.mrb[6].mxu0 }
 0x5b7   : > { %v752_v29 = vpop.f32.mrb[7].mxu0 }
 0x5be   : > { %v468_v30 = vpop.f32.mrb[8].mxu0 }
 0x5bf   : > { %590 = vrot.lane.b32.xlu0 %v468_v30, %s970_s13  ;;  %v763_v31 = vpop.f32.mrb[9].mxu0 }
 0x5c0   : > { %v471_v32 = vpop.f32.mrb[10].mxu0 }
 0x5c1   : > { %v764_v33 = vpop.f32.mrb[11].mxu0 }
 0x5c6   : > { %v579_v35 = vpop.f32.mrb[12].mxu0 }
 0x5c7   : > { %594 = vrot.lane.b32.xlu1 %v579_v35, %s971_s14  ;;  %v775_v0 = vpop.f32.mrb[13].mxu0 }
 0x5c8   : > { %v582_v36 = vpop.f32.mrb[14].mxu0 }
 0x5c9   : > { %v776_v37 = vpop.f32.mrb[15].mxu0 }
 0x627   : > { %v587_v38 = vpop.permute.xlu1 %586 }
 0x628   : > { %v597_v40 = vsel %vm138_vm1, %v1139_v34, %v587_v38 }
 0x631   : > { %v591_v39 = vpop.permute.xlu0 %590 }
 0x632   : > { %v599_v41 = vsel %vm598_vm6, %v597_v40, %v591_v39 }
 0x639   : > { %v595_v42 = vpop.permute.xlu1 %594 }
 0x63a   : > { %v601_v44 = vsel %vm600_vm7, %v599_v41, %v595_v42 }
 0x63b   : > { %v602_v45 = vpack.c.bf16 %v601_v44, %v601_v44 }
 0x63d   : > { %v607_v34 = vsel %vm605_vm10, %v602_v45, %v606_v43 }
 0x63e   : > { %608 = vst [vmem:[%s131_s22] sm:$0x7] %v607_v34 }
 0x63f   : > { %899 = shalt.err (!%p896_p4)
}
 0x640   : > { %s900_s21 = scalar_lea.hbm %s1169_s17, 64  ;;  %s904_s3 = scalar_lea.hbm %s1214_s1, 128 }
 0x641   : > { %p901_p5 = scmp.ne.s32.totalorder %s1169_s17, %s900_s21  ;;  %p905_p0 = scmp.lt.u32.totalorder %s1169_s17, %s1214_s1 }
 0x642   : > { %p906_p1 = scmp.lt.u32.totalorder %s904_s3, %s900_s21  ;;  %p908_p6 = scmp.lt.u32.totalorder %s900_s21, %s1169_s17 }
 0x643   : > { %p902_p8 = pnand %p901_p5, %p1223_p11 }
 0x644   : > { %p907_p3 = por %p906_p1, %p905_p0 }
 0x645   : > { %p903_p9 = pneg %p902_p8 }
 0x646   : > { %p909_p12 = por %p908_p6, %p907_p3 }
 0x648   : > { %p910_p13 = pnand %p909_p12, %p903_p9 }
 0x64a   : > { %913 = shalt.err (!%p910_p13)
}
 0x64b   : > { %779 = dma.vmem_to_hbm [thread:$0]  (%p1223_p11), %s1171_s23, 64, %s1169_s17, %s610_s26  }
 0x64c PF: > { %s635_s11 = sand.u32 1, %s940_s6   ;;  %p1224_p7 = scmp.ne.s32.totalorder %s1219_s19, 0 }
 0x64d   : > { %p1225_p10 = scmp.ge.s32.totalorder %s952_s9, 2  ;;  %s636_s13 = scalar_lea.sflag [#allocation4], %s635_s11 }
 0x64f   : > { %p786_p2 = pnand %p1225_p10, %p1224_p7 }
 0x651   : > { %935 = dma.done.wait (!%p786_p2), %s636_s13, 64  }
 0x652   : > { %937 = vsyncadd (!%p786_p2), %s636_s13, 4294967232  ;;  %p14_p4 = scmp.ge.s32.totalorder %s1008_s12, 4   ;;  %s1226_s6 = smov %s944_s7 }
 0x653   : > { %s1227_s7 = smov %s948_s8  ;;  %s1228_s8 = smov %s1020_s15 }
 0x654   : > { %s1229_s9 = smov %s1008_s12  ;;  %16 = sbr.rel (!%p14_p4) target bundleno = 5 (0x5), region = 69 }
 0x65b   :  { %641 = vsyncpa [#allocation3], 1 }
 0x65c   :  { %643 = vsyncpa [#allocation3 + $0x1], 1 }
 0x65d   :  { %644 = vsyncpa [#allocation4], 1 }
 0x65e   :  { %646 = vsyncpa [#allocation4 + $0x1], 1 }

// kernel: _lambda_.19
= control target key start
LH: loop header
LB: loop body
LE: loop exit
PB: predicated region body
PF: predicated region fallthrough
CT: control target
= control target key end

     0   :  { %8 = vsyncpa [#allocation3], 0  ;;  %s320_s0 = inlined_call_operand.hbm [shape: f32[10,32], index: 0, kind: input, shape index: {}]   ;;  %s321_s1 = inlined_call_operand.hbm [shape: f32[1,32], index: 1, kind: input, shape index: {}]   ;;  %s322_s2 = inlined_call_operand.hbm [shape: f32[1,32], index: 2, kind: input, shape index: {}]   ;;  %s323_s3 = inlined_call_operand.hbm [shape: f32[10,32], index: 3, kind: output, shape index: {}]  }
   0x1   :  { %9 = vsyncpa [#allocation6], 0 }
   0x2   :  { %10 = vsyncpa [#allocation4], 0  ;;  %s227_s12 = smov [#allocation5]   ;;  %s228_s14 = smov [#allocation2]  }
   0x3   :  { %s29_s13 = sshll.u32 %s227_s12, 4  ;;  %s16_s15 = sshll.u32 %s228_s14, 4  ;;  %s30_s13 = int_to_ptr.vmem [resolvable:$true] %s29_s13  ;;  %s253_s15 = int_to_ptr.vmem [resolvable:$true] %s16_s15 }
   0x4   :  { %s133_s18 = scalar_lea.hbm %s321_s1, 16 }
   0x5   :  { %p134_p0 = scmp.ne.s32.totalorder %s321_s1, %s133_s18  ;;  %p137_p1 = scmp.lt.u32.totalorder %s133_s18, %s321_s1 }
   0x7   :  { %p139_p2 = pnand %p137_p1, %p134_p0 }
   0x9   :  { %142 = shalt.err (!%p139_p2)
}
   0xa   :  { %s143_s23 = scalar_lea.vmem %s30_s13, 16  ;;  %s147_s24 = scalar_lea.vmem %s30_s13, 32 }
   0xb   :  { %p144_p3 = scmp.ne.s32.totalorder %s30_s13, %s143_s23  ;;  %p148_p4 = scmp.lt.s32.totalorder %s30_s13, %s30_s13 }
   0xc   :  { %p149_p5 = scmp.lt.s32.totalorder %s147_s24, %s143_s23 }
   0xe   :  { %p150_p6 = por %p149_p5, %p148_p4 }
  0x10   :  { %p151_p7 = pnand %p150_p6, %p144_p3 }
  0x12   :  { %154 = shalt.err (!%p151_p7)
}
  0x13   :  { %32 = dma.hbm_to_vmem [thread:$0]  %s321_s1, 16, %s30_s13, [#allocation6]  }
  0x14   :  { %s155_s29 = scalar_lea.hbm %s320_s0, 256 }
  0x15   :  { %p156_p8 = scmp.ne.s32.totalorder %s320_s0, %s155_s29  ;;  %p159_p9 = scmp.lt.u32.totalorder %s155_s29, %s320_s0 }
  0x17   :  { %p161_p10 = pnand %p159_p9, %p156_p8 }
  0x19   :  { %164 = shalt.err (!%p161_p10)
}
  0x1a   :  { %s165_s7 = scalar_lea.vmem %s253_s15, 256  ;;  %p170_p12 = scmp.lt.s32.totalorder %s253_s15, %s253_s15 }
  0x1b   :  { %p166_p11 = scmp.ne.s32.totalorder %s253_s15, %s165_s7  ;;  %p171_p13 = scmp.lt.s32.totalorder %s165_s7, %s165_s7 }
  0x1d   :  { %p172_p0 = por %p171_p13, %p170_p12 }
  0x1f   :  { %p173_p1 = pnand %p172_p0, %p166_p11 }
  0x21   :  { %176 = shalt.err (!%p173_p1)
}
  0x22   :  { %s229_s1 = smov 128   ;;  %s230_s8 = smov 8  }
  0x23   :  { %22 = dma.hbm_to_vmem [thread:$0]  %s320_s0, 256, %s253_s15, [#allocation3], %s229_s1, %s229_s1, %s230_s8  }
  0x24   :  { %s231_s11 = smov [#allocation7]   ;;  %s177_s16 = scalar_lea.hbm %s322_s2, 16 }
  0x25   :  { %s39_s12 = sshll.u32 %s231_s11, 4  ;;  %p178_p2 = scmp.ne.s32.totalorder %s322_s2, %s177_s16  ;;  %s40_s12 = int_to_ptr.vmem [resolvable:$true] %s39_s12 }
  0x26   :  { %p181_p3 = scmp.lt.u32.totalorder %s177_s16, %s322_s2 }
  0x28   :  { %p183_p4 = pnand %p181_p3, %p178_p2 }
  0x2a   :  { %186 = shalt.err (!%p183_p4)
}
  0x2b   :  { %s187_s21 = scalar_lea.vmem %s40_s12, 16  ;;  %s191_s0 = scalar_lea.vmem %s40_s12, 32 }
  0x2c   :  { %p188_p5 = scmp.ne.s32.totalorder %s40_s12, %s187_s21  ;;  %p192_p6 = scmp.lt.s32.totalorder %s40_s12, %s40_s12 }
  0x2d   :  { %p193_p7 = scmp.lt.s32.totalorder %s191_s0, %s187_s21 }
  0x2f   :  { %p194_p8 = por %p193_p7, %p192_p6 }
  0x31   :  { %p195_p9 = pnand %p194_p8, %p188_p5 }
  0x33   :  { %198 = shalt.err (!%p195_p9)
}
  0x34   :  { %42 = dma.hbm_to_vmem [thread:$0]  %s322_s2, 16, %s40_s12, [#allocation6]  }
  0x35   :  { %221 = dma.done.wait [#allocation3], 256  }
  0x36   :  { %222 = vsyncadd [#allocation3], 4294967040 }
  0x37   :  { %223 = dma.done.wait [#allocation6], 32  }
  0x38   :  { %224 = vsyncadd [#allocation6], 4294967264  ;;  %vm56_vm0 = vcmask 261120   ;;  %v52_v0 = vld [vmem:[#allocation2] sm:$0xff]  ;;  %v53_v1 = vld [vmem:[#allocation2 + $0x8] sm:$0x3] }
  0x39   :  { %vm60_vm1 = vcmask 254976   ;;  %v57_v2 = vsel %vm56_vm0, %v52_v0, 0.0  ;;  %v121_v21 = vld [vmem:[#allocation5] ss:$0 sm:$0xff]  ;;  %v122_v23 = vld [vmem:[#allocation7] ss:$0 sm:$0xff] }
  0x3a   :  { %58 = vadd.xlane.f32.xlu0 %v57_v2  ;;  %v61_v3 = vsel %vm60_vm1, %v53_v1, 0.0  ;;  %s232_s2 = smov [#allocation8]  }
  0x3b   :  { %s108_s23 = sshll.u32 %s232_s2, 4  ;;  %s109_s23 = int_to_ptr.vmem [resolvable:$true] %s108_s23 }
  0x3c   :  { %s199_s24 = scalar_lea.vmem %s109_s23, 256  ;;  %p204_p11 = scmp.lt.s32.totalorder %s109_s23, %s109_s23 }
  0x3d   :  { %p200_p10 = scmp.ne.s32.totalorder %s109_s23, %s199_s24  ;;  %p205_p12 = scmp.lt.s32.totalorder %s199_s24, %s199_s24 }
  0x3e   :  { %62 = vadd.xlane.f32.xlu0 %v61_v3 }
  0x3f   :  { %p206_p13 = por %p205_p12, %p204_p11 }
  0x41   :  { %p207_p0 = pnand %p206_p13, %p200_p10 }
  0xc7   :  { %v59_v4 = vpop.xlane.xlu0 %58 }
  0xc8   :  { %v65_v5 = vmul.f32 0.03125, %v59_v4 }
  0xca   :  { %v67_v6 = vsub.f32 %v52_v0, %v65_v5 }
  0xcb   :  { %v63_v7 = vpop.xlane.xlu0 %62 }
  0xcc   :  { %v66_v8 = vmul.f32 0.03125, %v63_v7  ;;  %v69_v9 = vmul.f32 %v67_v6, %v67_v6 }
  0xce   :  { %v68_v10 = vsub.f32 %v53_v1, %v66_v8  ;;  %v71_v11 = vsel %vm56_vm0, %v69_v9, 0.0 }
  0xcf   :  { %72 = vadd.xlane.f32.xlu1 %v71_v11 }
  0xd0   :  { %v70_v12 = vmul.f32 %v68_v10, %v68_v10 }
  0xd2   :  { %v74_v13 = vsel %vm60_vm1, %v70_v12, 0.0 }
  0xd3   :  { %75 = vadd.xlane.f32.xlu1 %v74_v13 }
 0x15c   :  { %v73_v14 = vpop.xlane.xlu1 %72 }
 0x15d   :  { %v77_v15 = vmul.f32 0.03125, %v73_v14 }
 0x15f   :  { %v79_v16 = vadd.f32 1e-06, %v77_v15 }
 0x160   :  { %v76_v17 = vpop.xlane.xlu1 %75 }
 0x161   :  { %129 = vrsqrt.f32 %v79_v16  ;;  %v78_v18 = vmul.f32 0.03125, %v76_v17 }
 0x163   :  { %v80_v19 = vadd.f32 1e-06, %v78_v18 }
 0x165   :  { %131 = vrsqrt.f32 %v80_v19 }
 0x16b   :  { %v130_v20 = vpop.eup %129 }
 0x16c   :  { %v83_v22 = vmul.f32 %v130_v20, %v67_v6 }
 0x16e   :  { %v91_v24 = vmul.f32 %v121_v21, %v83_v22 }
 0x16f   :  { %v132_v25 = vpop.eup %131 }
 0x170   :  { %v84_v26 = vmul.f32 %v132_v25, %v68_v10  ;;  %v99_v27 = vadd.f32 %v122_v23, %v91_v24 }
 0x172   :  { %v92_v28 = vmul.f32 %v121_v21, %v84_v26  ;;  %101 = vst.msk [vmem:[#allocation8] sm:$0xff] %vm56_vm0, %v99_v27 }
 0x174   :  { %v100_v29 = vadd.f32 %v122_v23, %v92_v28 }
 0x176   :  { %102 = vst.msk [vmem:[#allocation8 + $0x8] sm:$0x3] %vm60_vm1, %v100_v29 }
 0x177   :  { %210 = shalt.err (!%p207_p0)
}
 0x178   :  { %s211_s27 = scalar_lea.hbm %s323_s3, 256 }
 0x179   :  { %p212_p1 = scmp.ne.s32.totalorder %s323_s3, %s211_s27  ;;  %p215_p2 = scmp.lt.u32.totalorder %s211_s27, %s323_s3 }
 0x17b   :  { %p217_p3 = pnand %p215_p2, %p212_p1 }
 0x17d   :  { %220 = shalt.err (!%p217_p3)
}
 0x17e   :  { %114 = dma.vmem_to_hbm [thread:$0]  %s109_s23, 256, %s323_s3, [#allocation4], %s229_s1, %s229_s1, %s230_s8  }
 0x17f   :  { %225 = dma.done.wait [#allocation4], 256  }
 0x180   :  { %226 = vsyncadd [#allocation4], 4294967040 }
 0x181   :  { %118 = vsyncpa [#allocation3], 1 }
 0x182   :  { %119 = vsyncpa [#allocation6], 1 }
 0x183   :  { %120 = vsyncpa [#allocation4], 1 }

// kernel: _lambda_.14
= control target key start
LH: loop header
LB: loop body
LE: loop exit
PB: predicated region body
PF: predicated region fallthrough
CT: control target
= control target key end

     0   :  { %12 = vsyncpa [#allocation3], 0  ;;  %s849_s0 = inlined_call_operand.hbm [shape: f32[10,32], index: 0, kind: input, shape index: {}]   ;;  %s850_s1 = inlined_call_operand.hbm [shape: f32[1,32], index: 1, kind: input, shape index: {}]   ;;  %s851_s2 = inlined_call_operand.hbm [shape: f32[1,32], index: 2, kind: input, shape index: {}]   ;;  %s852_s3 = inlined_call_operand.hbm [shape: bf16[32,128], index: 3, kind: input, shape index: {}]   ;;  %s853_s4 = inlined_call_operand.hbm [shape: f32[1,128], index: 4, kind: input, shape index: {}]   ;;  %s854_s5 = inlined_call_operand.hbm [shape: bf16[128,32], index: 5, kind: input, shape index: {}]   ;;  %s855_s6 = inlined_call_operand.hbm [shape: f32[1,32], index: 6, kind: input, shape index: {}]   ;;  %s856_s7 = inlined_call_operand.hbm [shape: f32[10,32], index: 7, kind: output, shape index: {}]  }
   0x1   :  { %13 = vsyncpa [#allocation6], 0 }
   0x2   :  { %14 = vsyncpa [#allocation9], 0 }
   0x3   :  { %15 = vsyncpa [#allocation12], 0 }
   0x4   :  { %16 = vsyncpa [#allocation4], 0  ;;  %s662_s24 = smov [#allocation5]   ;;  %s663_s26 = smov [#allocation8]  }
   0x5   :  { %s35_s25 = sshll.u32 %s662_s24, 4  ;;  %s54_s27 = sshll.u32 %s663_s26, 4  ;;  %s36_s25 = int_to_ptr.vmem [resolvable:$true] %s35_s25  ;;  %s716_s27 = int_to_ptr.vmem [resolvable:$true] %s54_s27 }
   0x6   :  { %s476_s30 = scalar_lea.hbm %s850_s1, 16 }
   0x7   :  { %p477_p0 = scmp.ne.s32.totalorder %s850_s1, %s476_s30  ;;  %p480_p1 = scmp.lt.u32.totalorder %s476_s30, %s850_s1 }
   0x9   :  { %p482_p2 = pnand %p480_p1, %p477_p0 }
   0xb   :  { %485 = shalt.err (!%p482_p2)
}
   0xc   :  { %s486_s12 = scalar_lea.vmem %s36_s25, 16  ;;  %s490_s13 = scalar_lea.vmem %s36_s25, 32 }
   0xd   :  { %p487_p3 = scmp.ne.s32.totalorder %s36_s25, %s486_s12  ;;  %p491_p4 = scmp.lt.s32.totalorder %s36_s25, %s36_s25 }
   0xe   :  { %p492_p5 = scmp.lt.s32.totalorder %s490_s13, %s486_s12 }
  0x10   :  { %p493_p6 = por %p492_p5, %p491_p4 }
  0x12   :  { %p494_p7 = pnand %p493_p6, %p487_p3 }
  0x14   :  { %497 = shalt.err (!%p494_p7)
}
  0x15   :  { %38 = dma.hbm_to_vmem [thread:$0]  %s850_s1, 16, %s36_s25, [#allocation6]  }
  0x16   :  { %s498_s18 = scalar_lea.hbm %s852_s3, 256 }
  0x17   :  { %p499_p8 = scmp.ne.s32.totalorder %s852_s3, %s498_s18  ;;  %p502_p9 = scmp.lt.u32.totalorder %s498_s18, %s852_s3 }
  0x19   :  { %p504_p10 = pnand %p502_p9, %p499_p8 }
  0x1b   :  { %507 = shalt.err (!%p504_p10)
}
  0x1c   :  { %s508_s23 = scalar_lea.vmem %s716_s27, 256  ;;  %p513_p12 = scmp.lt.s32.totalorder %s716_s27, %s716_s27 }
  0x1d   :  { %p509_p11 = scmp.ne.s32.totalorder %s716_s27, %s508_s23  ;;  %p514_p13 = scmp.lt.s32.totalorder %s508_s23, %s508_s23 }
  0x1f   :  { %p515_p0 = por %p514_p13, %p513_p12 }
  0x21   :  { %p516_p1 = pnand %p515_p0, %p509_p11 }
  0x23   :  { %519 = shalt.err (!%p516_p1)
}
  0x24   :  { %s664_s1 = smov 64   ;;  %s665_s24 = smov 4  }
  0x25   :  { %60 = dma.hbm_to_vmem [thread:$0]  %s852_s3, 256, %s716_s27, [#allocation9], %s664_s1, %s664_s1, %s665_s24  }
  0x26   :  { %s666_s28 = smov [#allocation11]   ;;  %s667_s30 = smov [#allocation2]  }
  0x27   :  { %s76_s29 = sshll.u32 %s666_s28, 4  ;;  %s22_s8 = sshll.u32 %s667_s30, 4  ;;  %s77_s29 = int_to_ptr.vmem [resolvable:$true] %s76_s29  ;;  %s747_s8 = int_to_ptr.vmem [resolvable:$true] %s22_s8 }
  0x28   :  { %s520_s11 = scalar_lea.hbm %s854_s5, 1024 }
  0x29   :  { %p521_p2 = scmp.ne.s32.totalorder %s854_s5, %s520_s11  ;;  %p524_p3 = scmp.lt.u32.totalorder %s520_s11, %s854_s5 }
  0x2b   :  { %p526_p4 = pnand %p524_p3, %p521_p2 }
  0x2d   :  { %529 = shalt.err (!%p526_p4)
}
  0x2e   :  { %s530_s3 = scalar_lea.vmem %s77_s29, 1024  ;;  %p535_p6 = scmp.lt.s32.totalorder %s77_s29, %s77_s29 }
  0x2f   :  { %p531_p5 = scmp.ne.s32.totalorder %s77_s29, %s530_s3  ;;  %p536_p7 = scmp.lt.s32.totalorder %s530_s3, %s530_s3 }
  0x31   :  { %p537_p8 = por %p536_p7, %p535_p6 }
  0x33   :  { %p538_p9 = pnand %p537_p8, %p531_p5 }
  0x35   :  { %541 = shalt.err (!%p538_p9)
}
  0x36   :  { %82 = dma.hbm_to_vmem [thread:$0]  %s854_s5, 1024, %s77_s29, [#allocation12], %s664_s1, %s664_s1, %s665_s24  }
  0x37   :  { %s542_s19 = scalar_lea.hbm %s849_s0, 256 }
  0x38   :  { %p543_p10 = scmp.ne.s32.totalorder %s849_s0, %s542_s19  ;;  %p546_p11 = scmp.lt.u32.totalorder %s542_s19, %s849_s0 }
  0x3a   :  { %p548_p12 = pnand %p546_p11, %p543_p10 }
  0x3c   :  { %551 = shalt.err (!%p548_p12)
}
  0x3d   :  { %s552_s25 = scalar_lea.vmem %s747_s8, 256  ;;  %p557_p0 = scmp.lt.s32.totalorder %s747_s8, %s747_s8 }
  0x3e   :  { %p553_p13 = scmp.ne.s32.totalorder %s747_s8, %s552_s25  ;;  %p558_p1 = scmp.lt.s32.totalorder %s552_s25, %s552_s25 }
  0x40   :  { %p559_p2 = por %p558_p1, %p557_p0 }
  0x42   :  { %p560_p3 = pnand %p559_p2, %p553_p13 }
  0x44   :  { %563 = shalt.err (!%p560_p3)
}
  0x45   :  { %s668_s5 = smov 128   ;;  %s669_s1 = smov 8  }
  0x46   :  { %28 = dma.hbm_to_vmem [thread:$0]  %s849_s0, 256, %s747_s8, [#allocation3], %s668_s5, %s668_s5, %s669_s1  }
  0x47   :  { %s670_s28 = smov [#allocation7]   ;;  %s671_s30 = smov [#allocation10]  }
  0x48   :  { %s45_s29 = sshll.u32 %s670_s28, 4  ;;  %s67_s9 = sshll.u32 %s671_s30, 4  ;;  %s46_s29 = int_to_ptr.vmem [resolvable:$true] %s45_s29  ;;  %s68_s9 = int_to_ptr.vmem [resolvable:$true] %s67_s9 }
  0x49   :  { %s564_s12 = scalar_lea.hbm %s851_s2, 16 }
  0x4a   :  { %p565_p4 = scmp.ne.s32.totalorder %s851_s2, %s564_s12  ;;  %p568_p5 = scmp.lt.u32.totalorder %s564_s12, %s851_s2 }
  0x4c   :  { %p570_p6 = pnand %p568_p5, %p565_p4 }
  0x4e   :  { %573 = shalt.err (!%p570_p6)
}
  0x4f   :  { %s574_s0 = scalar_lea.vmem %s46_s29, 16  ;;  %s578_s8 = scalar_lea.vmem %s46_s29, 32 }
  0x50   :  { %p575_p7 = scmp.ne.s32.totalorder %s46_s29, %s574_s0  ;;  %p579_p8 = scmp.lt.s32.totalorder %s46_s29, %s46_s29 }
  0x51   :  { %p580_p9 = scmp.lt.s32.totalorder %s578_s8, %s574_s0 }
  0x53   :  { %p581_p10 = por %p580_p9, %p579_p8 }
  0x55   :  { %p582_p11 = pnand %p581_p10, %p575_p7 }
  0x57   :  { %585 = shalt.err (!%p582_p11)
}
  0x58   :  { %48 = dma.hbm_to_vmem [thread:$0]  %s851_s2, 16, %s46_s29, [#allocation6]  }
  0x59   :  { %s586_s19 = scalar_lea.hbm %s853_s4, 16 }
  0x5a   :  { %p587_p12 = scmp.ne.s32.totalorder %s853_s4, %s586_s19  ;;  %p590_p13 = scmp.lt.u32.totalorder %s586_s19, %s853_s4 }
  0x5c   :  { %p592_p0 = pnand %p590_p13, %p587_p12 }
  0x5e   :  { %595 = shalt.err (!%p592_p0)
}
  0x5f   :  { %s596_s25 = scalar_lea.vmem %s68_s9, 16  ;;  %s600_s24 = scalar_lea.vmem %s68_s9, 32 }
  0x60   :  { %p597_p1 = scmp.ne.s32.totalorder %s68_s9, %s596_s25  ;;  %p601_p2 = scmp.lt.s32.totalorder %s68_s9, %s68_s9 }
  0x61   :  { %p602_p3 = scmp.lt.s32.totalorder %s600_s24, %s596_s25 }
  0x63   :  { %p603_p4 = por %p602_p3, %p601_p2 }
  0x65   :  { %p604_p5 = pnand %p603_p4, %p597_p1 }
  0x67   :  { %607 = shalt.err (!%p604_p5)
}
  0x68   :  { %70 = dma.hbm_to_vmem [thread:$0]  %s853_s4, 16, %s68_s9, [#allocation9]  }
  0x69   :  { %s672_s28 = smov [#allocation13]   ;;  %s608_s11 = scalar_lea.hbm %s855_s6, 16 }
  0x6a   :  { %s89_s29 = sshll.u32 %s672_s28, 4  ;;  %p609_p6 = scmp.ne.s32.totalorder %s855_s6, %s608_s11  ;;  %s90_s29 = int_to_ptr.vmem [resolvable:$true] %s89_s29 }
  0x6b   :  { %p612_p7 = scmp.lt.u32.totalorder %s608_s11, %s855_s6 }
  0x6d   :  { %p614_p8 = pnand %p612_p7, %p609_p6 }
  0x6f   :  { %617 = shalt.err (!%p614_p8)
}
  0x70   :  { %s618_s3 = scalar_lea.vmem %s90_s29, 16  ;;  %s622_s4 = scalar_lea.vmem %s90_s29, 32 }
  0x71   :  { %p619_p9 = scmp.ne.s32.totalorder %s90_s29, %s618_s3  ;;  %p623_p10 = scmp.lt.s32.totalorder %s90_s29, %s90_s29 }
  0x72   :  { %p624_p11 = scmp.lt.s32.totalorder %s622_s4, %s618_s3 }
  0x74   :  { %p625_p12 = por %p624_p11, %p623_p10 }
  0x76   :  { %p626_p13 = pnand %p625_p12, %p619_p9 }
  0x78   :  { %629 = shalt.err (!%p626_p13)
}
  0x79   :  { %92 = dma.hbm_to_vmem [thread:$0]  %s855_s6, 16, %s90_s29, [#allocation12]  }
  0x7a   :  { %652 = dma.done.wait [#allocation3], 256  }
  0x7b   :  { %653 = vsyncadd [#allocation3], 4294967040 }
  0x7c   :  { %654 = dma.done.wait [#allocation6], 32  }
  0x7d   :  { %655 = vsyncadd [#allocation6], 4294967264 }
  0x7e   :  { %656 = dma.done.wait [#allocation9], 272  }
  0x7f   :  { %657 = vsyncadd [#allocation9], 4294967024 }
  0x80   :  { %658 = dma.done.wait [#allocation12], 1040  }
  0x81   :  { %659 = vsyncadd [#allocation12], 4294966256  ;;  %vm119_vm0 = vcmask 261120   ;;  %vm123_vm1 = vcmask 254976   ;;  %v817_v0 = vld [vmem:[#allocation2] sm:$0xff]  ;;  %v458_v14 = vld [vmem:[#allocation8] sm:$0xff]  }
  0x82   :  { %v819_v1 = vld [vmem:[#allocation2 + $0x8] sm:$0x3]  ;;  %v120_v2 = vsel %vm119_vm0, %v817_v0, 0.0  ;;  %v673_v15 = vmov 0.0   ;;  %v459_v16 = vld [vmem:[#allocation8 + $0x8] sm:$0xff]   ;;  %vm674_vm2 = vmmov 0  }
  0x83   :  { %v124_v3 = vsel %vm123_vm1, %v819_v1, 0.0  ;;  %121 = vadd.xlane.f32.xlu0 %v120_v2  ;;  %416 = vmatprep.subr.bf16.mxu0 %v673_v15  ;;  %v389_v25 = vld [vmem:[#allocation5] ss:$0 sm:$0xff]  ;;  %v390_v29 = vld [vmem:[#allocation7] ss:$0 sm:$0xff]  ;;  %v460_v34 = vld [vmem:[#allocation11] sm:$0xff]  }
  0x84   :  { %424 = vmatprep.subr.bf16.mxu1 %v673_v15  ;;  %417 = vmatpush3.bf16.msra.mxu0 %v458_v14  ;;  %v461_v35 = vld [vmem:[#allocation11 + $0x8] sm:$0xff]   ;;  %v462_v36 = vld [vmem:[#allocation11 + $0x10] sm:$0xff]   ;;  %v463_v37 = vld [vmem:[#allocation11 + $0x18] sm:$0xff]   ;;  %s675_s6 = smov [#allocation14]  }
  0x85   :  { %420 = vmatprep.mubr.msk.bf16.mxu0 %vm674_vm2, %v673_v15  ;;  %418 = vmatprep.subr.bf16.mxu0 %v673_v15  ;;  %v464_v38 = vld [vmem:[#allocation11 + $0x20] sm:$0xff]   ;;  %v465_v39 = vld [vmem:[#allocation11 + $0x28] sm:$0xff]   ;;  %v466_v40 = vld [vmem:[#allocation11 + $0x30] sm:$0xff]   ;;  %s374_s8 = sshll.u32 %s675_s6, 4  ;;  %s375_s8 = int_to_ptr.vmem [resolvable:$true] %s374_s8 }
  0x86   :  { %440 = vmatprep.mubr.msk.bf16.mxu1 %vm674_vm2, %v673_v15  ;;  %425 = vmatpush3.bf16.msra.mxu1 %v460_v34  ;;  %v467_v41 = vld [vmem:[#allocation11 + $0x38] sm:$0xff]   ;;  %s630_s27 = scalar_lea.vmem %s375_s8, 256  ;;  %p635_p1 = scmp.lt.s32.totalorder %s375_s8, %s375_s8 }
  0x87   :  { %125 = vadd.xlane.f32.xlu0 %v124_v3  ;;  %426 = vmatprep.subr.bf16.mxu1 %v673_v15  ;;  %v391_v42 = vld [vmem:[#allocation10] ss:$0 sm:$0xff]  ;;  %p631_p0 = scmp.ne.s32.totalorder %s375_s8, %s630_s27  ;;  %p636_p2 = scmp.lt.s32.totalorder %s630_s27, %s630_s27 }
  0x88   :  { %419 = vmatpush3.bf16.msra.mxu0 %v459_v16 }
  0x89   :  { %p637_p3 = por %p636_p2, %p635_p1 }
  0x8a   :  { %427 = vmatpush3.bf16.msra.mxu1 %v461_v35 }
  0x8b   :  { %428 = vmatprep.subr.bf16.mxu1 %v673_v15  ;;  %p638_p4 = pnand %p637_p3, %p631_p0 }
  0x8e   :  { %429 = vmatpush3.bf16.msra.mxu1 %v462_v36 }
  0x8f   :  { %430 = vmatprep.subr.bf16.mxu1 %v673_v15 }
  0x92   :  { %431 = vmatpush3.bf16.msra.mxu1 %v463_v37 }
  0x93   :  { %432 = vmatprep.subr.bf16.mxu1 %v673_v15 }
  0x96   :  { %433 = vmatpush3.bf16.msra.mxu1 %v464_v38 }
  0x97   :  { %434 = vmatprep.subr.bf16.mxu1 %v673_v15 }
  0x9a   :  { %435 = vmatpush3.bf16.msra.mxu1 %v465_v39 }
  0x9b   :  { %436 = vmatprep.subr.bf16.mxu1 %v673_v15 }
  0x9e   :  { %437 = vmatpush3.bf16.msra.mxu1 %v466_v40 }
  0x9f   :  { %438 = vmatprep.subr.bf16.mxu1 %v673_v15 }
  0xa2   :  { %439 = vmatpush3.bf16.msra.mxu1 %v467_v41 }
 0x110   :  { %v122_v4 = vpop.xlane.xlu0 %121 }
 0x111   :  { %v128_v5 = vmul.f32 0.03125, %v122_v4 }
 0x113   :  { %v130_v6 = vsub.f32 %v817_v0, %v128_v5 }
 0x114   :  { %v126_v7 = vpop.xlane.xlu0 %125 }
 0x115   :  { %v129_v8 = vmul.f32 0.03125, %v126_v7  ;;  %v132_v9 = vmul.f32 %v130_v6, %v130_v6  ;;  %v403_v7 = vld [vmem:[#allocation13] ss:$0 sm:$0xff] }
 0x117   :  { %v131_v10 = vsub.f32 %v819_v1, %v129_v8  ;;  %v134_v11 = vsel %vm119_vm0, %v132_v9, 0.0 }
 0x118   :  { %135 = vadd.xlane.f32.xlu1 %v134_v11 }
 0x119   :  { %v133_v12 = vmul.f32 %v131_v10, %v131_v10 }
 0x11b   :  { %v137_v13 = vsel %vm123_vm1, %v133_v12, 0.0 }
 0x11c   :  { %138 = vadd.xlane.f32.xlu1 %v137_v13 }
 0x1a5   :  { %v136_v17 = vpop.xlane.xlu1 %135 }
 0x1a6   :  { %v140_v18 = vmul.f32 0.03125, %v136_v17 }
 0x1a8   :  { %v142_v19 = vadd.f32 1e-06, %v140_v18 }
 0x1a9   :  { %v139_v20 = vpop.xlane.xlu1 %138 }
 0x1aa   :  { %468 = vrsqrt.f32 %v142_v19  ;;  %v141_v21 = vmul.f32 0.03125, %v139_v20 }
 0x1ac   :  { %v143_v22 = vadd.f32 1e-06, %v141_v21 }
 0x1ae   :  { %470 = vrsqrt.f32 %v143_v22 }
 0x1b4   :  { %v469_v23 = vpop.eup %468 }
 0x1b5   :  { %v146_v24 = vmul.f32 %v469_v23, %v130_v6 }
 0x1b7   :  { %v154_v28 = vmul.f32 %v389_v25, %v146_v24 }
 0x1b8   :  { %v471_v26 = vpop.eup %470 }
 0x1b9   :  { %v147_v27 = vmul.f32 %v471_v26, %v131_v10  ;;  %v162_v31 = vadd.f32 %v390_v29, %v154_v28 }
 0x1bb   :  { %v155_v30 = vmul.f32 %v389_v25, %v147_v27 }
 0x1bd   :  { %v163_v32 = vadd.f32 %v390_v29, %v155_v30 }
 0x1bf   :  { %v164_v33 = vpack.c.bf16 %v163_v32, %v162_v31 }
 0x1c1   :  { %421 = vmatmul.mubr.msk.bf16.vlgmr.msra.gmra.mrb[0].mxu0 %vm119_vm0, %v164_v33 }
 0x294   :  { %v225_v43 = vpop.f32.mrb[0].mxu0 }
 0x295   :  { %v226_v44 = vadd.f32 %v391_v42, %v225_v43  ;;  %v422_v45 = vpop.f32.mrb[1].mxu0 }
 0x296   :  { %v228_v46 = vpop.f32.mrb[2].mxu0 }
 0x297   :  { %v234_v47 = vmul.f32 0.044715, %v226_v44  ;;  %v229_v48 = vadd.f32 %v391_v42, %v228_v46  ;;  %v423_v49 = vpop.f32.mrb[3].mxu0  ;;  %v232_v62 = vmul.f32 0.5, %v226_v44 }
 0x299   :  { %v236_v50 = vmul.f32 %v234_v47, %v226_v44  ;;  %v235_v51 = vmul.f32 0.044715, %v229_v48  ;;  %v233_v63 = vmul.f32 0.5, %v229_v48 }
 0x29b   :  { %v238_v52 = vmul.f32 %v236_v50, %v226_v44  ;;  %v237_v53 = vmul.f32 %v235_v51, %v229_v48 }
 0x29d   :  { %v239_v54 = vmul.f32 %v237_v53, %v229_v48  ;;  %v240_v55 = vadd.f32 %v238_v52, %v226_v44 }
 0x29f   :  { %v241_v56 = vadd.f32 %v239_v54, %v229_v48  ;;  %v242_v57 = vmul.f32 0.7978846, %v240_v55 }
 0x2a1   :  { %v243_v58 = vmul.f32 0.7978846, %v241_v56  ;;  %472 = vtanh.f32 %v242_v57 }
 0x2a3   :  { %474 = vtanh.f32 %v243_v58 }
 0x2ab   :  { %v473_v59 = vpop.eup %472 }
 0x2ac   :  { %v246_v60 = vadd.f32 1.0, %v473_v59 }
 0x2ad   :  { %v475_v61 = vpop.eup %474 }
 0x2ae   :  { %v247_v2 = vadd.f32 1.0, %v475_v61  ;;  %v248_v3 = vmul.f32 %v246_v60, %v232_v62 }
 0x2b0   :  { %v249_v4 = vmul.f32 %v247_v2, %v233_v63 }
 0x2b2   :  { %v250_v5 = vpack.c.bf16 %v249_v4, %v248_v3 }
 0x2b4   :  { %441 = vmatmul.mubr.bf16.vlgmr.msra.gmra.mrb[0].mxu1 %v250_v5 }
 0x387   :  { %v349_v6 = vpop.f32.mrb[0].mxu1 }
 0x388   :  { %v356_v8 = vadd.f32 %v349_v6, %v817_v0  ;;  %v442_v9 = vpop.f32.mrb[1].mxu1 }
 0x389   :  { %v352_v10 = vpop.f32.mrb[2].mxu1 }
 0x38a   :  { %v365_v11 = vadd.f32 %v403_v7, %v356_v8  ;;  %v357_v12 = vadd.f32 %v352_v10, %v819_v1  ;;  %v443_v13 = vpop.f32.mrb[3].mxu1 }
 0x38c   :  { %367 = vst.msk [vmem:[#allocation14] sm:$0xff] %vm119_vm0, %v365_v11  ;;  %v366_v14 = vadd.f32 %v403_v7, %v357_v12 }
 0x38e   :  { %368 = vst.msk [vmem:[#allocation14 + $0x8] sm:$0x3] %vm123_vm1, %v366_v14 }
 0x38f   :  { %641 = shalt.err (!%p638_p4)
}
 0x390   :  { %s642_s18 = scalar_lea.hbm %s856_s7, 256 }
 0x391   :  { %p643_p5 = scmp.ne.s32.totalorder %s856_s7, %s642_s18  ;;  %p646_p6 = scmp.lt.u32.totalorder %s642_s18, %s856_s7 }
 0x393   :  { %p648_p7 = pnand %p646_p6, %p643_p5 }
 0x395   :  { %651 = shalt.err (!%p648_p7)
}
 0x396   :  { %380 = dma.vmem_to_hbm [thread:$0]  %s375_s8, 256, %s856_s7, [#allocation4], %s668_s5, %s668_s5, %s669_s1  }
 0x397   :  { %660 = dma.done.wait [#allocation4], 256  }
 0x398   :  { %661 = vsyncadd [#allocation4], 4294967040 }
 0x399   :  { %384 = vsyncpa [#allocation3], 1 }
 0x39a   :  { %385 = vsyncpa [#allocation6], 1 }
 0x39b   :  { %386 = vsyncpa [#allocation9], 1 }
 0x39c   :  { %387 = vsyncpa [#allocation12], 1 }
 0x39d   :  { %388 = vsyncpa [#allocation4], 1 }

</bundles_post_ra>
